<compile_context>
chip_gen: v7x
topology: tpu7x:2x2x1
jax: 0.10.0
libtpu: 0.0.40
codegen_flags: <defaults>
</compile_context>

<pallas_src>
import numpy as np
import jax
import jax.numpy as jnp
from jax.experimental import pallas as pl
from jax.experimental.pallas import tpu as pltpu

# Keep f32 matmuls at full precision (reference einsums + f32 kernel mode) so the
# f32 path agrees tightly with the pure-JAX reference.
jax.config.update("jax_default_matmul_precision", "highest")


# ----------------------------------------------------------------------------------
# Small helpers
# ----------------------------------------------------------------------------------
def _round_up(x, m):
    return (x + m - 1) // m * m


def _vmem_limit_bytes():
    """Generation-aware VMEM request: ~3/4 of physical capacity, capped at 100 MiB,
    leaving headroom for Mosaic-internal scratch/semaphores (v7x has only 64 MiB)."""
    cap = None
    try:
        cap = getattr(pltpu.get_tpu_info(), "vmem_capacity_bytes", None)
    except Exception:
        cap = None
    if not cap:
        cap = 64 * 1024 * 1024  # conservative fallback (v7x physical per-TC VMEM)
    return int(min(cap * 3 // 4, 100 * 1024 * 1024))


# ----------------------------------------------------------------------------------
# Static weight-matrix builders (shape-only, built once in the wrapper with numpy).
# ----------------------------------------------------------------------------------
def _pool_matrix(out_size, in_size):
    """M such that pooled = M @ x implements PyTorch AdaptiveAvgPool along one dim."""
    m = np.zeros((out_size, in_size), np.float32)
    for i in range(out_size):
        a = (i * in_size) // out_size
        b = ((i + 1) * in_size + out_size - 1) // out_size  # ceil
        m[i, a:b] = 1.0 / (b - a)
    return m


def _upsample_matrix(out_size, in_size):
    """U such that up = U @ x implements 1-D bilinear interp (align_corners=False)."""
    u = np.zeros((out_size, in_size), np.float32)
    scale = in_size / out_size
    for y in range(out_size):
        src = max((y + 0.5) * scale - 0.5, 0.0)
        i0 = min(int(np.floor(src)), in_size - 1)
        i1 = min(i0 + 1, in_size - 1)
        l1 = src - i0
        u[y, i0] += 1.0 - l1
        u[y, i1] += l1
    return u


def _build_spatial_matrices(H, W, sizes, hwp, kp):
    """G (HWp, Kp): pooling weights for all pyramid bins.  A^T (Kp, HWp): bilinear
    upsample weights per pixel, plus an all-ones bias row at index K."""
    HW = H * W
    g_blocks, a_blocks = [], []
    for s in sizes:
        mh, mw = _pool_matrix(s, H), _pool_matrix(s, W)
        g_blocks.append(np.einsum("ih,jw->ijhw", mh, mw).reshape(s * s, HW))
        uh, uw = _upsample_matrix(H, s), _upsample_matrix(W, s)
        a_blocks.append(np.einsum("yi,xj->yxij", uh, uw).reshape(HW, s * s))
    k = sum(s * s for s in sizes)
    g = np.zeros((hwp, kp), np.float32)
    g[:HW, :k] = np.concatenate(g_blocks, axis=0).T
    a_t = np.zeros((kp, hwp), np.float32)
    a_t[:k, :HW] = np.concatenate(a_blocks, axis=1).T
    a_t[k, :HW] = 1.0  # bias row: multiplies R[..., k] = bottleneck bias
    return g, a_t


# ----------------------------------------------------------------------------------
# Pallas kernels
# ----------------------------------------------------------------------------------
def _psp_pool_kernel(x_ref, g_ref, o_ref):
    # x_ref: (bc_block, T)  rows of the flattened (B*C, HW) map, one spatial tile
    # g_ref: (T, Kp)        pooling weights for this spatial tile (all pyramid bins)
    # o_ref: (bc_block, Kp) f32 accumulator, resident across the reduction axis
    @pl.when(pl.program_id(1) == 0)
    def _():
        o_ref[...] = jnp.zeros_like(o_ref)

    o_ref[...] += jnp.dot(x_ref[...], g_ref[...], preferred_element_type=jnp.float32)


def _psp_bottleneck_kernel(x_ref, at_ref, r_ref, wf_ref, o_ref):
    # x_ref : (1, C, T)   feature tile of batch b (streamed)
    # at_ref: (Kp, T)     bilinear-upsample weights (+ ones bias row) for this tile
    # r_ref : (1, O, Kp)  folded pyramid responses + bias for batch b (resident)
    # wf_ref: (O, C)      bottleneck weights of the identity branch (resident)
    # o_ref : (1, O, T)   lane-dense output tile
    acc = jnp.dot(wf_ref[...], x_ref[0], preferred_element_type=jnp.float32)      # (O, T)
    acc = acc + jnp.dot(r_ref[0], at_ref[...], preferred_element_type=jnp.float32)
    o_ref[0] = jnp.maximum(acc, 0.0).astype(o_ref.dtype)


# ----------------------------------------------------------------------------------
# Wrapper
# ----------------------------------------------------------------------------------
def psp_forward(feats, stage_ws, wb, bb, sizes=(1, 2, 3, 6), *,
                compute_dtype=jnp.bfloat16, out_dtype=None, hw_tile=None):
    """PSPModule forward.

    feats: (B, C, H, W); stage_ws: list of (C, C, 1, 1) (one per size, no bias);
    wb: (O, C*(len(sizes)+1), 1, 1) bottleneck weight; bb: (O,) bottleneck bias.
    compute_dtype: streaming dtype for the big operands (bf16 recommended; f32 exact).
    Returns (B, O, H, W) in out_dtype (default: feats.dtype).
    """
    B, C, H, W = feats.shape
    O = wb.shape[0]
    n_stage = len(sizes)
    HW = H * W
    K = sum(s * s for s in sizes)
    Kp = _round_up(K + 1, 128)          # +1 for the bias column, padded lane-dense
    out_dtype = feats.dtype if out_dtype is None else out_dtype
    in_isz = np.dtype(compute_dtype).itemsize
    out_isz = np.dtype(out_dtype).itemsize
    vmem_limit = _vmem_limit_bytes()

    # Spatial (lane) tile: one tile when small; otherwise the largest multiple of 128
    # whose double-buffered streams (x tile + A tile + out tile) fit ~half the VMEM
    # request, leaving the rest for the resident weights and compiler scratch.
    if hw_tile is None:
        hwp_min = _round_up(HW, 128)
        if hwp_min <= 2048:
            hw_tile = hwp_min
        else:
            bytes_per_col = 2 * ((C + Kp) * in_isz + O * out_isz)
            budget = vmem_limit // 2
            hw_tile = int(np.clip((budget // bytes_per_col) // 128 * 128, 128, 2048))
    assert hw_tile % 128 == 0, "hw_tile must be a multiple of 128"
    HWp = _round_up(HW, hw_tile)
    num_tiles = HWp // hw_tile

    x3 = feats.reshape(B, C, HW)
    if HWp != HW:
        x3 = jnp.pad(x3, ((0, 0), (0, 0), (0, HWp - HW)))
    # bf16 streaming of the dominant operand (f32 accumulation happens on the MXU).
    x3 = x3.astype(compute_dtype)

    g_np, at_np = _build_spatial_matrices(H, W, sizes, HWp, Kp)
    g_mat = jnp.asarray(g_np, dtype=compute_dtype)
    a_t_mat = jnp.asarray(at_np, dtype=compute_dtype)

    # ---- Kernel 1: all pyramid adaptive-average pools as one tiled H*W reduction ----
    BC = B * C
    bc_block = min(_round_up(BC, 8), 512)     # bounded row block (v7x 64 MiB VMEM)
    BCp = _round_up(BC, bc_block)
    x2 = x3.reshape(BC, HWp)
    if BCp != BC:
        x2 = jnp.pad(x2, ((0, BCp - BC), (0, 0)))

    pooled = pl.pallas_call(
        _psp_pool_kernel,
        out_shape=jax.ShapeDtypeStruct((BCp, Kp), jnp.float32),
        grid=(BCp // bc_block, num_tiles),
        in_specs=[
            pl.BlockSpec((bc_block, hw_tile), lambda i, k: (i, k)),
            pl.BlockSpec((hw_tile, Kp), lambda i, k: (k, 0)),
        ],
        out_specs=pl.BlockSpec((bc_block, Kp), lambda i, k: (i, 0)),  # resident acc
        compiler_params=pltpu.CompilerParams(
            dimension_semantics=("parallel", "arbitrary"),  # reduction axis last
            vmem_limit_bytes=vmem_limit,
        ),
        cost_estimate=pl.CostEstimate(
            flops=int(2 * BCp * HWp * Kp),
            transcendentals=0,
            bytes_accessed=int(in_isz * (BCp * HWp + (BCp // bc_block) * HWp * Kp)
                               + 4 * BCp * Kp),
        ),
    )(x2, g_mat)
    pooled = pooled[:BC, :K].reshape(B, C, K)

    # ---- Tiny glue (KBs): fold stage 1x1 conv + bottleneck channel-block into R ----
    wb2 = wb.reshape(O, (n_stage + 1) * C).astype(jnp.float32)
    r_parts, off = [], 0
    for idx, s in enumerate(sizes):
        n = s * s
        p_s = pooled[:, :, off:off + n]                                      # (B, C, n)
        w_s = stage_ws[idx].reshape(C, C).astype(jnp.float32)
        q_s = jnp.einsum("dc,bcn->bdn", w_s, p_s)                            # stage conv
        r_parts.append(jnp.einsum("od,bdn->bon", wb2[:, idx * C:(idx + 1) * C], q_s))
        off += n
    r_parts.append(jnp.broadcast_to(bb.astype(jnp.float32)[None, :, None], (B, O, 1)))
    r_mat = jnp.concatenate(r_parts, axis=-1)                                # (B, O, K+1)
    r_mat = jnp.pad(r_mat, ((0, 0), (0, 0), (0, Kp - (K + 1)))).astype(compute_dtype)
    w_feat = wb2[:, n_stage * C:].astype(compute_dtype)                      # (O, C)

    # ---- Kernel 2: fused upsample + concat + bottleneck 1x1 conv + bias + ReLU ----
    # Batch is a parallel grid axis (no per-b Python loop, no re-pushed weights per b);
    # each step is two full-N matmuls and one lane-dense (O, hw_tile) store.
    # (If profiling on v7x shows exposed DMA, pipeline_mode=pl.Buffered(3) on the
    #  x / A specs is the next knob.)
    out3 = pl.pallas_call(
        _psp_bottleneck_kernel,
        out_shape=jax.ShapeDtypeStruct((B, O, HWp), out_dtype),
        grid=(B, num_tiles),
        in_specs=[
            pl.BlockSpec((1, C, hw_tile), lambda b, j: (b, 0, j)),    # streamed x tile
            pl.BlockSpec((Kp, hw_tile), lambda b, j: (0, j)),         # streamed A tile
            pl.BlockSpec((1, O, Kp), lambda b, j: (b, 0, 0)),         # resident per b
            pl.BlockSpec((O, C), lambda b, j: (0, 0)),                # resident
        ],
        out_specs=pl.BlockSpec((1, O, hw_tile), lambda b, j: (b, 0, j)),
        compiler_params=pltpu.CompilerParams(
            dimension_semantics=("parallel", "parallel"),
            vmem_limit_bytes=vmem_limit,
        ),
        cost_estimate=pl.CostEstimate(
            flops=int(2 * B * O * HWp * (C + Kp)),
            transcendentals=0,
            bytes_accessed=int(in_isz * (B * C * HWp + B * Kp * HWp + B * O * Kp + O * C)
                               + out_isz * B * O * HWp),
        ),
    )(x3, a_t_mat, r_mat, w_feat)

    return out3[:, :, :HW].reshape(B, O, H, W)


# ----------------------------------------------------------------------------------
# Pure-JAX reference mirroring the PyTorch forward (independent code path).
# ----------------------------------------------------------------------------------
def _adaptive_avg_pool_ref(x, s):
    B, C, H, W = x.shape
    rows = []
    for i in range(s):
        h0, h1 = (i * H) // s, ((i + 1) * H + s - 1) // s
        cols = []
        for j in range(s):
            w0, w1 = (j * W) // s, ((j + 1) * W + s - 1) // s
            cols.append(jnp.mean(x[:, :, h0:h1, w0:w1], axis=(2, 3)))
        rows.append(jnp.stack(cols, axis=-1))
    return jnp.stack(rows, axis=-2)  # (B, C, s, s)


def _upsample_bilinear_ref(x, H, W):
    """F.interpolate(..., mode='bilinear', align_corners=False)."""
    _, _, h, w = x.shape

    def src_index(out_size, in_size):
        scale = in_size / out_size
        src = np.maximum((np.arange(out_size) + 0.5) * scale - 0.5, 0.0)
        i0 = np.minimum(np.floor(src).astype(np.int64), in_size - 1)
        i1 = np.minimum(i0 + 1, in_size - 1)
        l1 = (src - i0).astype(np.float32)
        return i0, i1, 1.0 - l1, l1

    y0, y1, ly0, ly1 = src_index(H, h)
    x0, x1, lx0, lx1 = src_index(W, w)

    def gather(yi, xi):
        return x[:, :, yi, :][:, :, :, xi]

    top = gather(y0, x0) * lx0[None, None, None, :] + gather(y0, x1) * lx1[None, None, None, :]
    bot = gather(y1, x0) * lx0[None, None, None, :] + gather(y1, x1) * lx1[None, None, None, :]
    return top * ly0[None, None, :, None] + bot * ly1[None, None, :, None]


def psp_forward_ref(feats, stage_ws, wb, bb, sizes=(1, 2, 3, 6)):
    B, C, H, W = feats.shape
    O = wb.shape[0]
    xf = feats.astype(jnp.float32)
    priors = []
    for s, ws in zip(sizes, stage_ws):
        pooled = _adaptive_avg_pool_ref(xf, s)
        conv = jnp.einsum("dc,bcij->bdij", ws.reshape(C, C).astype(jnp.float32), pooled)
        priors.append(_upsample_bilinear_ref(conv, H, W))
    priors.append(xf)
    cat = jnp.concatenate(priors, axis=1)
    out = jnp.einsum("ok,bkyx->boyx", wb.reshape(O, -1).astype(jnp.float32), cat)
    out = out + bb.astype(jnp.float32)[None, :, None, None]
    return jnp.maximum(out, 0.0).astype(feats.dtype)


# ----------------------------------------------------------------------------------
if __name__ == "__main__":
    # Small shapes consistent with the module: features=32, out_features=64,
    # sizes=(1,2,3,6); H=W=15 exercises uneven adaptive-pool bins and spatial padding.
    B, C, H, W = 2, 32, 15, 15
    O = 64
    sizes = (1, 2, 3, 6)

    key = jax.random.PRNGKey(0)
    ks = jax.random.split(key, 3 + len(sizes))
    x = jax.random.normal(ks[0], (B, C, H, W), dtype=jnp.float32)
    stage_ws = [
        jax.random.normal(ks[1 + i], (C, C, 1, 1), dtype=jnp.float32) / np.sqrt(C)
        for i in range(len(sizes))
    ]
    wb = jax.random.normal(
        ks[1 + len(sizes)], (O, C * (len(sizes) + 1), 1, 1), dtype=jnp.float32
    ) / np.sqrt(C * (len(sizes) + 1))
    bb = jax.random.normal(ks[2 + len(sizes)], (O,), dtype=jnp.float32) * 0.1

    ref = psp_forward_ref(x, stage_ws, wb, bb, sizes=sizes)

    # Exact-math check: f32 streaming, tight tolerance.
    out_f32 = jax.block_until_ready(
        psp_forward(x, stage_ws, wb, bb, sizes=sizes, compute_dtype=jnp.float32))
    assert out_f32.shape == (B, O, H, W)
    err32 = float(jnp.max(jnp.abs(out_f32 - ref)))
    assert err32 < 2e-3, f"f32 mismatch vs reference: max abs err {err32}"

    # Default perf path: bf16 operand streaming with f32 accumulation (looser tol).
    out_bf16 = jax.block_until_ready(psp_forward(x, stage_ws, wb, bb, sizes=sizes))
    assert out_bf16.shape == (B, O, H, W)
    err16 = float(jnp.max(jnp.abs(out_bf16 - ref)))
    assert err16 < 5e-2, f"bf16 mismatch vs reference: max abs err {err16}"

    print("KERNEL_OK")
</pallas_src>

<mosaic_0001>
module attributes {stable_mosaic.version = 11 : i64} {
  func.func @_psp_pool_kernel(%arg0: i32, %arg1: i32, %arg2: memref<64x256xf32, #tpu.memory_space<vmem>>, %arg3: memref<256x128xf32, #tpu.memory_space<vmem>>, %arg4: memref<64x128xf32, #tpu.memory_space<vmem>>) attributes {dimension_semantics = [#tpu.dimension_semantics<parallel>, #tpu.dimension_semantics<arbitrary>], iteration_bounds = array<i64: 1, 1>, scalar_prefetch = 0 : i64, scratch_operands = 0 : i64, tpu.core_type = #tpu.core_type<tc>, window_params = [{transform_indices = @transform_0, window_bounds = array<i64: 64, 256>}, {transform_indices = @transform_1, window_bounds = array<i64: 256, 128>}, {transform_indices = @transform_2, window_bounds = array<i64: 64, 128>}]} {
    %c0_i32 = arith.constant 0 : i32
    %0 = arith.cmpi eq, %arg1, %c0_i32 : i32
    %1 = arith.extui %0 : i1 to i32
    %c0_i32_0 = arith.constant 0 : i32
    %2 = arith.cmpi ne, %1, %c0_i32_0 : i32
    scf.if %2 {
      %cst_8 = arith.constant 0.000000e+00 : f32
      %9 = vector.broadcast %cst_8 : f32 to vector<64x128xf32>
      %c0_9 = arith.constant 0 : index
      %c0_10 = arith.constant 0 : index
      %10 = vector.load %arg4[%c0_9, %c0_10] : memref<64x128xf32, #tpu.memory_space<vmem>>, vector<64x128xf32>
      tpu.vector_store %arg4[%c0_9, %c0_10], %9 {strides = array<i32>} : memref<64x128xf32, #tpu.memory_space<vmem>>, vector<64x128xf32>,
    } else {
    }
    %c0 = arith.constant 0 : index
    %c0_1 = arith.constant 0 : index
    %3 = vector.load %arg4[%c0, %c0_1] : memref<64x128xf32, #tpu.memory_space<vmem>>, vector<64x128xf32>
    %c0_2 = arith.constant 0 : index
    %c0_3 = arith.constant 0 : index
    %4 = vector.load %arg2[%c0_2, %c0_3] : memref<64x256xf32, #tpu.memory_space<vmem>>, vector<64x256xf32>
    %c0_4 = arith.constant 0 : index
    %c0_5 = arith.constant 0 : index
    %5 = vector.load %arg3[%c0_4, %c0_5] : memref<256x128xf32, #tpu.memory_space<vmem>>, vector<256x128xf32>
    %cst = arith.constant dense<0.000000e+00> : vector<64x128xf32>
    %6 = tpu.matmul %4, %5, %cst {dimension_numbers = #tpu.dot_dimension_numbers<[1], [0], [0], [1], [0, 0, 1, 1], [], []>, precision = #tpu.contract_precision<fp32>} : vector<64x256xf32>, vector<256x128xf32>, vector<64x128xf32> -> vector<64x128xf32>
    %7 = arith.addf %3, %6 : vector<64x128xf32>
    %c0_6 = arith.constant 0 : index
    %c0_7 = arith.constant 0 : index
    %8 = vector.load %arg4[%c0_6, %c0_7] : memref<64x128xf32, #tpu.memory_space<vmem>>, vector<64x128xf32>
    tpu.vector_store %arg4[%c0_6, %c0_7], %7 {strides = array<i32>} : memref<64x128xf32, #tpu.memory_space<vmem>>, vector<64x128xf32>,
    return
  }
  func.func @transform_0(%arg0: i32, %arg1: i32) -> (i32, i32) {
    %c0_i32 = arith.constant 0 : i32
    return %arg0, %arg1 : i32, i32
  }
  func.func @transform_1(%arg0: i32, %arg1: i32) -> (i32, i32) {
    %c0_i32 = arith.constant 0 : i32
    %c0_i32_0 = arith.constant 0 : i32
    return %arg1, %c0_i32 : i32, i32
  }
  func.func @transform_2(%arg0: i32, %arg1: i32) -> (i32, i32) {
    %c0_i32 = arith.constant 0 : i32
    %c0_i32_0 = arith.constant 0 : i32
    return %arg0, %c0_i32 : i32, i32
  }
}

</mosaic_0001>

<bundles_post_ra>
// kernel: tpu_custom_call.1
= control target key start
LH: loop header
LB: loop body
LE: loop exit
PB: predicated region body
PF: predicated region fallthrough
CT: control target
= control target key end

     0   :  { %7 = vsyncpa [#allocation3], 0  ;;  %s2691_s0 = inlined_call_operand.hbm [shape: f32[64,256], index: 0, kind: input, shape index: {}]   ;;  %s2692_s1 = inlined_call_operand.hbm [shape: f32[256,128], index: 1, kind: input, shape index: {}]   ;;  %s2693_s2 = inlined_call_operand.hbm [shape: f32[64,128], index: 2, kind: output, shape index: {}]  }
   0x1   :  { %8 = vsyncpa [#allocation6], 0 }
   0x2   :  { %9 = vsyncpa [#allocation4], 0  ;;  %s2004_s9 = smov [#allocation2]   ;;  %s1932_s13 = scalar_lea.hbm %s2691_s0, 2048 }
   0x3   :  { %s15_s10 = sshll.u32 %s2004_s9, 4  ;;  %p1933_p0 = scmp.ne.s32.totalorder %s2691_s0, %s1932_s13  ;;  %s16_s10 = int_to_ptr.vmem [resolvable:$true] %s15_s10 }
   0x4   :  { %p1936_p1 = scmp.lt.u32.totalorder %s1932_s13, %s2691_s0 }
   0x6   :  { %p1938_p2 = pnand %p1936_p1, %p1933_p0 }
   0x8   :  { %1941 = shalt.err (!%p1938_p2)
}
   0x9   :  { %s1942_s18 = scalar_lea.vmem %s16_s10, 2048  ;;  %p1947_p4 = scmp.lt.s32.totalorder %s16_s10, %s16_s10 }
   0xa   :  { %p1943_p3 = scmp.ne.s32.totalorder %s16_s10, %s1942_s18  ;;  %p1948_p5 = scmp.lt.s32.totalorder %s1942_s18, %s1942_s18 }
   0xc   :  { %p1949_p6 = por %p1948_p5, %p1947_p4 }
   0xe   :  { %p1950_p7 = pnand %p1949_p6, %p1943_p3 }
  0x10   :  { %1953 = shalt.err (!%p1950_p7)
}
  0x11   :  { %s2005_s19 = smov 256   ;;  %s2006_s20 = smov 16  }
  0x12   :  { %21 = dma.hbm_to_vmem [thread:$0]  %s2691_s0, 2048, %s16_s10, [#allocation3], %s2005_s19, %s2005_s19, %s2006_s20  }
  0x13   :  { %s2007_s23 = smov [#allocation5]   ;;  %s1954_s27 = scalar_lea.hbm %s2692_s1, 4096 }
  0x14   :  { %s27_s24 = sshll.u32 %s2007_s23, 4  ;;  %p1955_p8 = scmp.ne.s32.totalorder %s2692_s1, %s1954_s27  ;;  %s28_s24 = int_to_ptr.vmem [resolvable:$true] %s27_s24 }
  0x15   :  { %p1958_p9 = scmp.lt.u32.totalorder %s1954_s27, %s2692_s1 }
  0x17   :  { %p1960_p10 = pnand %p1958_p9, %p1955_p8 }
  0x19   :  { %1963 = shalt.err (!%p1960_p10)
}
  0x1a   :  { %s1964_s4 = scalar_lea.vmem %s28_s24, 4096  ;;  %p1969_p12 = scmp.lt.s32.totalorder %s28_s24, %s28_s24 }
  0x1b   :  { %p1965_p11 = scmp.ne.s32.totalorder %s28_s24, %s1964_s4  ;;  %p1970_p13 = scmp.lt.s32.totalorder %s1964_s4, %s1964_s4 }
  0x1d   :  { %p1971_p0 = por %p1970_p13, %p1969_p12 }
  0x1f   :  { %p1972_p1 = pnand %p1971_p0, %p1965_p11 }
  0x21   :  { %1975 = shalt.err (!%p1972_p1)
}
  0x22   :  { %s2008_s0 = smov 128   ;;  %s2009_s5 = smov 8  }
  0x23   :  { %33 = dma.hbm_to_vmem [thread:$0]  %s2692_s1, 4096, %s28_s24, [#allocation6], %s2008_s0, %s2008_s0, %s2009_s5  }
  0x24   :  { %1998 = dma.done.wait [#allocation3], 2048  }
  0x25   :  { %1999 = vsyncadd [#allocation3], 4294965248 }
  0x26   :  { %2000 = dma.done.wait [#allocation6], 4096  }
  0x27   :  { %2001 = vsyncadd [#allocation6], 4294963200  ;;  %v92_v0 = vld [vmem:[#allocation5 + $0x80] sm:$0xff]  ;;  %v93_v1 = vld [vmem:[#allocation5 + $0x88] sm:$0xff]  ;;  %s2010_s1 = smov [#allocation7]  }
  0x28   :  { %v76_v2 = vld [vmem:[#allocation5] sm:$0xff]  ;;  %v157_v3 = vand.u32 4294901760, %v92_v0  ;;  %v160_v4 = vand.u32 4294901760, %v93_v1  ;;  %v77_v5 = vld [vmem:[#allocation5 + $0x8] sm:$0xff]  ;;  %v94_v7 = vld [vmem:[#allocation5 + $0x90] sm:$0xff]  ;;  %s1383_s8 = sshll.u32 %s2010_s1, 4  ;;  %s1384_s8 = int_to_ptr.vmem [resolvable:$true] %s1383_s8 }
  0x29   :  { %v109_v6 = vand.u32 4294901760, %v76_v2  ;;  %v95_v8 = vld [vmem:[#allocation5 + $0x98] sm:$0xff]  ;;  %v112_v9 = vand.u32 4294901760, %v77_v5  ;;  %v163_v10 = vand.u32 4294901760, %v94_v7  ;;  %v78_v12 = vld [vmem:[#allocation5 + $0x10] sm:$0xff]  ;;  %v96_v18 = vld [vmem:[#allocation5 + $0xa0] sm:$0xff]  ;;  %p1981_p3 = scmp.lt.s32.totalorder %s1384_s8, %s1384_s8 }
  0x2a   :  { %v166_v11 = vand.u32 4294901760, %v95_v8  ;;  %v79_v13 = vld [vmem:[#allocation5 + $0x18] sm:$0xff]  ;;  %v2053_v14 = vpack.c.bf16 %v160_v4, %v157_v3  ;;  %v115_v16 = vand.u32 4294901760, %v78_v12  ;;  %v97_v19 = vld [vmem:[#allocation5 + $0xa8] sm:$0xff]  ;;  %v80_v24 = vld [vmem:[#allocation5 + $0x20] sm:$0xff]  ;;  %v169_v30 = vand.u32 4294901760, %v96_v18 }
  0x2b   :  { %v2055_v15 = vsub.f32 %v76_v2, %v109_v6  ;;  %v118_v17 = vand.u32 4294901760, %v79_v13  ;;  %v2057_v20 = vpack.c.bf16 %v112_v9, %v109_v6  ;;  %v2059_v21 = vsub.f32 %v77_v5, %v112_v9  ;;  %v81_v25 = vld [vmem:[#allocation5 + $0x28] sm:$0xff]  ;;  %v98_v38 = vld [vmem:[#allocation5 + $0xb0] sm:$0xff]  ;;  %v99_v43 = vld [vmem:[#allocation5 + $0xb8] sm:$0xff]  ;;  %s1976_s9 = scalar_lea.vmem %s1384_s8, 1024 }
  0x2c   :  { %v2061_v22 = vpack.c.bf16 %v166_v11, %v163_v10  ;;  %v2063_v23 = vsub.f32 %v94_v7, %v163_v10  ;;  %1733 = vmatprep.subr.bf16.mxu0 %v2053_v14  ;;  %v2066_v26 = vsub.f32 %v95_v8, %v166_v11  ;;  %v2070_v28 = vsub.f32 %v78_v12, %v115_v16  ;;  %v82_v56 = vld [vmem:[#allocation5 + $0x30] sm:$0xff]  ;;  %v83_v57 = vld [vmem:[#allocation5 + $0x38] sm:$0xff]  ;;  %v100_v6 = vld [vmem:[#allocation5 + $0xc0] sm:$0xff]  ;;  %p1977_p2 = scmp.ne.s32.totalorder %s1384_s8, %s1976_s9  ;;  %p1982_p4 = scmp.lt.s32.totalorder %s1976_s9, %s1976_s9 }
  0x2d   :  { %2804 = vst [vmem:[#allocation11_spill] sm:$0xff] %v2057_v20  ;;  %v2068_v27 = vpack.c.bf16 %v118_v17, %v115_v16  ;;  %v2072_v29 = vsub.f32 %v79_v13, %v118_v17  ;;  %1735 = vmatpush3.bf16.msra.mxu0 %v2057_v20  ;;  %v172_v31 = vand.u32 4294901760, %v97_v19  ;;  %v2075_v32 = vsub.f32 %v92_v0, %v157_v3  ;;  %v101_v7 = vld [vmem:[#allocation5 + $0xc8] sm:$0xff]  ;;  %v84_v12 = vld [vmem:[#allocation5 + $0x40] sm:$0xff] }
  0x2e   :  { %v2077_v33 = vsub.f32 %v93_v1, %v160_v4  ;;  %1737 = vmatprep.subr.bf16.mxu0 %v2061_v22  ;;  %v121_v34 = vand.u32 4294901760, %v80_v24  ;;  %v124_v35 = vand.u32 4294901760, %v81_v25  ;;  %v2710_v36 = vand.u32 4294901760, %v2055_v15  ;;  %p1983_p5 = por %p1982_p4, %p1981_p3 }
  0x2f   :  { %2805 = vst [vmem:[#allocation12_spill] sm:$0xff] %v2072_v29  ;;  %v2708_v37 = vand.u32 4294901760, %v2059_v21  ;;  %v2082_v39 = vpack.c.bf16 %v172_v31, %v169_v30  ;;  %v2084_v40 = vsub.f32 %v96_v18, %v169_v30  ;;  %v2086_v41 = vsub.f32 %v97_v19, %v172_v31  ;;  %v85_v31 = vld [vmem:[#allocation5 + $0x48] sm:$0xff] }
  0x30   :  { %v2713_v42 = vand.u32 4294901760, %v2075_v32  ;;  %v2712_v44 = vand.u32 4294901760, %v2077_v33  ;;  %v2090_v45 = vpack.c.bf16 %v124_v35, %v121_v34  ;;  %v2092_v46 = vsub.f32 %v80_v24, %v121_v34  ;;  %p1984_p6 = pnand %p1983_p5, %p1977_p2 }
  0x31   :  { %2806 = vst [vmem:[#allocation13_spill] sm:$0xff] %v2086_v41  ;;  %v2094_v47 = vsub.f32 %v81_v25, %v124_v35  ;;  %1739 = vmatpush3.bf16.msra.mxu0 %v2068_v27  ;;  %v329_v49 = vsub.f32 %v2055_v15, %v2710_v36  ;;  %v336_v50 = vsub.f32 %v2059_v21, %v2708_v37  ;;  %v175_v51 = vand.u32 4294901760, %v98_v38 }
  0x32   :  { %v441_v48 = vsub.f32 %v2075_v32, %v2713_v42  ;;  %1741 = vmatprep.subr.bf16.mxu0 %v2082_v39  ;;  %v448_v52 = vsub.f32 %v2077_v33, %v2712_v44  ;;  %v178_v53 = vand.u32 4294901760, %v99_v43  ;;  %v2707_v54 = vand.u32 4294901760, %v2063_v23  ;;  %v61_v44 = vld [vmem:[#allocation2 + $0x8] sm:$0xff]  ;;  %v60_v42 = vld [vmem:[#allocation2] sm:$0xff] }
  0x33   :  { %v2705_v55 = vand.u32 4294901760, %v2066_v26  ;;  %v330_v59 = vand.u32 4294901760, %v329_v49  ;;  %v337_v60 = vand.u32 4294901760, %v336_v50  ;;  %v2112_v61 = vsub.f32 %v98_v38, %v175_v51 }
  0x34   :  { %v442_v58 = vand.u32 4294901760, %v441_v48  ;;  %v449_v62 = vand.u32 4294901760, %v448_v52  ;;  %v2114_v63 = vpack.c.bf16 %v178_v53, %v175_v51  ;;  %v2116_v0 = vsub.f32 %v99_v43, %v178_v53 }
  0x35   :  { %v455_v1 = vsub.f32 %v2063_v23, %v2707_v54  ;;  %1743 = vmatpush3.bf16.msra.mxu0 %v2090_v45  ;;  %v1766_v2 = vpack.c.bf16 %v337_v60, %v330_v59  ;;  %v462_v3 = vsub.f32 %v2066_v26, %v2705_v55  ;;  %v127_v4 = vand.u32 4294901760, %v82_v56  ;;  %v103_v59 = vld [vmem:[#allocation5 + $0xd8] sm:$0xff] }
  0x36   :  { %v130_v5 = vand.u32 4294901760, %v83_v57  ;;  %v1764_v8 = vpack.c.bf16 %v449_v62, %v442_v58  ;;  %1745 = vmatprep.subr.bf16.mxu0 %v2114_v63  ;;  %v2703_v10 = vand.u32 4294901760, %v2070_v28  ;;  %v2702_v11 = vand.u32 4294901760, %v2072_v29  ;;  %v102_v58 = vld [vmem:[#allocation5 + $0xd0] sm:$0xff]  ;;  %v91_v54 = vld [vmem:[#allocation5 + $0x78] sm:$0xff] }
  0x37   :  { %v456_v9 = vand.u32 4294901760, %v455_v1  ;;  %v463_v13 = vand.u32 4294901760, %v462_v3  ;;  %v2130_v17 = vsub.f32 %v82_v56, %v127_v4  ;;  %v181_v25 = vand.u32 4294901760, %v100_v6  ;;  %v86_v3 = vld [vmem:[#allocation5 + $0x50] sm:$0xff] }
  0x38   :  { %v2128_v16 = vpack.c.bf16 %v130_v5, %v127_v4  ;;  %v2132_v18 = vsub.f32 %v83_v57, %v130_v5  ;;  %1765 = vmatprep.subr.bf16.mxu1 %v1764_v8  ;;  %v343_v19 = vsub.f32 %v2070_v28, %v2703_v10  ;;  %v350_v24 = vsub.f32 %v2072_v29, %v2702_v11  ;;  %v106_v11 = vld [vmem:[#allocation5 + $0xf0] sm:$0xff]  ;;  %v107_v10 = vld [vmem:[#allocation5 + $0xf8] sm:$0xff] }
  0x39   :  { %v184_v30 = vand.u32 4294901760, %v101_v7  ;;  %1767 = vmatpush3.bf16.msra.mxu1 %v1766_v2  ;;  %v1768_v34 = vpack.c.bf16 %v463_v13, %v456_v9  ;;  %v2700_v35 = vand.u32 4294901760, %v2084_v40  ;;  %v2698_v38 = vand.u32 4294901760, %v2086_v41 }
  0x3a   :  { %2807 = vst [vmem:[#allocation14_spill] sm:$0xff] %v2128_v16  ;;  %1747 = vmatpush3.bf16.msra.mxu0 %v2128_v16  ;;  %v133_v43 = vand.u32 4294901760, %v84_v12  ;;  %v344_v48 = vand.u32 4294901760, %v343_v19  ;;  %v351_v49 = vand.u32 4294901760, %v350_v24  ;;  %v2145_v51 = vsub.f32 %v100_v6, %v181_v25  ;;  %v87_v19 = vld [vmem:[#allocation5 + $0x58] sm:$0xff] }
  0x3b   :  { %v2143_v50 = vpack.c.bf16 %v184_v30, %v181_v25  ;;  %1769 = vmatprep.subr.bf16.mxu1 %v1768_v34  ;;  %v2147_v52 = vsub.f32 %v101_v7, %v184_v30  ;;  %v469_v53 = vsub.f32 %v2084_v40, %v2700_v35  ;;  %v476_v56 = vsub.f32 %v2086_v41, %v2698_v38 }
  0x3c   :  { %v136_v57 = vand.u32 4294901760, %v85_v31  ;;  %v1770_v60 = vpack.c.bf16 %v351_v49, %v344_v48  ;;  %v2156_v62 = vsub.f32 %v84_v12, %v133_v43  ;;  %v2697_v1 = vand.u32 4294901760, %v2092_v46 }
  0x3d   :  { %2808 = vst [vmem:[#allocation15_spill] sm:$0xff] %v2143_v50  ;;  %1749 = vmatprep.subr.bf16.mxu0 %v2143_v50  ;;  %v2695_v2 = vand.u32 4294901760, %v2094_v47  ;;  %v470_v4 = vand.u32 4294901760, %v469_v53  ;;  %v477_v5 = vand.u32 4294901760, %v476_v56  ;;  %v187_v12 = vand.u32 4294901760, %v102_v58 }
  0x3e   :  { %v2160_v6 = vpack.c.bf16 %v136_v57, %v133_v43  ;;  %v2162_v7 = vsub.f32 %v85_v31, %v136_v57  ;;  %1771 = vmatpush3.bf16.msra.mxu1 %v1770_v60  ;;  %v357_v8 = vsub.f32 %v2092_v46, %v2697_v1  ;;  %v190_v13 = vand.u32 4294901760, %v103_v59  ;;  %v89_v1 = vld [vmem:[#allocation5 + $0x68] sm:$0xff] }
  0x3f   :  { %v364_v9 = vsub.f32 %v2094_v47, %v2695_v2  ;;  %v1772_v24 = vpack.c.bf16 %v477_v5, %v470_v4  ;;  %v2694_v25 = vand.u32 4294901760, %v2112_v61  ;;  %v2696_v30 = vand.u32 4294901760, %v2116_v0  ;;  %v104_v4 = vld [vmem:[#allocation5 + $0xe0] sm:$0xff]  ;;  %v105_v5 = vld [vmem:[#allocation5 + $0xe8] sm:$0xff] }
  0x40   :  { %2809 = vst [vmem:[#allocation16_spill] sm:$0xff] %v2160_v6  ;;  %1751 = vmatpush3.bf16.msra.mxu0 %v2160_v6  ;;  %v139_v31 = vand.u32 4294901760, %v86_v3  ;;  %v358_v34 = vand.u32 4294901760, %v357_v8  ;;  %v2173_v48 = vpack.c.bf16 %v190_v13, %v187_v12  ;;  %v2175_v49 = vsub.f32 %v102_v58, %v187_v12  ;;  %v88_v12 = vld [vmem:[#allocation5 + $0x60] sm:$0xff] }
  0x41   :  { %v365_v43 = vand.u32 4294901760, %v364_v9  ;;  %1773 = vmatprep.subr.bf16.mxu1 %v1772_v24  ;;  %v2177_v53 = vsub.f32 %v103_v59, %v190_v13  ;;  %v483_v56 = vsub.f32 %v2112_v61, %v2694_v25  ;;  %v490_v57 = vsub.f32 %v2116_v0, %v2696_v30 }
  0x42   :  { %2810 = vst [vmem:[#allocation17_spill] sm:$0xff] %v2173_v48  ;;  %v142_v60 = vand.u32 4294901760, %v87_v19  ;;  %1753 = vmatprep.subr.bf16.mxu0 %v2173_v48  ;;  %v2186_v9 = vsub.f32 %v86_v3, %v139_v31  ;;  %v2699_v58 = vand.u32 4294901760, %v2130_v17  ;;  %v2701_v59 = vand.u32 4294901760, %v2132_v18 }
  0x43   :  { %v1774_v8 = vpack.c.bf16 %v365_v43, %v358_v34  ;;  %v484_v13 = vand.u32 4294901760, %v483_v56  ;;  %v491_v24 = vand.u32 4294901760, %v490_v57  ;;  %v193_v43 = vand.u32 4294901760, %v104_v4 }
  0x44   :  { %v2190_v25 = vpack.c.bf16 %v142_v60, %v139_v31  ;;  %v2192_v2 = vsub.f32 %v87_v19, %v142_v60  ;;  %v371_v34 = vsub.f32 %v2130_v17, %v2699_v58  ;;  %v378_v3 = vsub.f32 %v2132_v18, %v2701_v59 }
  0x45   :  { %1775 = vmatpush3.bf16.msra.mxu1 %v1774_v8  ;;  %v196_v30 = vand.u32 4294901760, %v105_v5  ;;  %v1776_v38 = vpack.c.bf16 %v491_v24, %v484_v13  ;;  %v2704_v31 = vand.u32 4294901760, %v2145_v51  ;;  %v2706_v19 = vand.u32 4294901760, %v2147_v52 }
  0x46   :  { %2811 = vst [vmem:[#allocation18_spill] sm:$0xff] %v2190_v25  ;;  %1755 = vmatpush3.bf16.msra.mxu0 %v2190_v25  ;;  %v145_v56 = vand.u32 4294901760, %v88_v12  ;;  %v372_v57 = vand.u32 4294901760, %v371_v34  ;;  %v379_v60 = vand.u32 4294901760, %v378_v3  ;;  %v2205_v58 = vsub.f32 %v104_v4, %v193_v43  ;;  %v90_v4 = vld [vmem:[#allocation5 + $0x70] sm:$0xff] }
  0x47   :  { %v2203_v8 = vpack.c.bf16 %v196_v30, %v193_v43  ;;  %1777 = vmatprep.subr.bf16.mxu1 %v1776_v38  ;;  %v2207_v35 = vsub.f32 %v105_v5, %v196_v30  ;;  %v497_v13 = vsub.f32 %v2145_v51, %v2704_v31  ;;  %v504_v24 = vsub.f32 %v2147_v52, %v2706_v19 }
  0x48   :  { %v148_v59 = vand.u32 4294901760, %v89_v1  ;;  %v1778_v34 = vpack.c.bf16 %v379_v60, %v372_v57  ;;  %v2216_v3 = vsub.f32 %v88_v12, %v145_v56  ;;  %v2709_v38 = vand.u32 4294901760, %v2156_v62 }
  0x49   :  { %2812 = vst [vmem:[#allocation19_spill] sm:$0xff] %v2203_v8  ;;  %1757 = vmatprep.subr.bf16.mxu0 %v2203_v8  ;;  %v2711_v30 = vand.u32 4294901760, %v2162_v7  ;;  %v498_v5 = vand.u32 4294901760, %v497_v13  ;;  %v505_v43 = vand.u32 4294901760, %v504_v24  ;;  %v199_v60 = vand.u32 4294901760, %v106_v11 }
  0x4a   :  { %v2220_v31 = vpack.c.bf16 %v148_v59, %v145_v56  ;;  %v2222_v55 = vsub.f32 %v89_v1, %v148_v59  ;;  %1779 = vmatpush3.bf16.msra.mxu1 %v1778_v34  ;;  %v385_v57 = vsub.f32 %v2156_v62, %v2709_v38  ;;  %v202_v19 = vand.u32 4294901760, %v107_v10 }
  0x4b   :  { %v392_v12 = vsub.f32 %v2162_v7, %v2711_v30  ;;  %v1780_v37 = vpack.c.bf16 %v505_v43, %v498_v5  ;;  %v2714_v56 = vand.u32 4294901760, %v2175_v49  ;;  %v2715_v1 = vand.u32 4294901760, %v2177_v53 }
  0x4c   :  { %2813 = vst [vmem:[#allocation20_spill] sm:$0xff] %v2220_v31  ;;  %1759 = vmatpush3.bf16.msra.mxu0 %v2220_v31  ;;  %v151_v59 = vand.u32 4294901760, %v90_v4  ;;  %v386_v13 = vand.u32 4294901760, %v385_v57  ;;  %v2233_v34 = vpack.c.bf16 %v202_v19, %v199_v60  ;;  %v2235_v38 = vsub.f32 %v106_v11, %v199_v60 }
  0x4d   :  { %v393_v24 = vand.u32 4294901760, %v392_v12  ;;  %1781 = vmatprep.subr.bf16.mxu1 %v1780_v37  ;;  %v2237_v36 = vsub.f32 %v107_v10, %v202_v19  ;;  %v511_v5 = vsub.f32 %v2175_v49, %v2714_v56  ;;  %v518_v43 = vsub.f32 %v2177_v53, %v2715_v1 }
  0x4e   :  { %2814 = vst [vmem:[#allocation21_spill] sm:$0xff] %v2233_v34  ;;  %2815 = vst [vmem:[#allocation22_spill] sm:$0xff] %v2235_v38  ;;  %v154_v30 = vand.u32 4294901760, %v91_v54  ;;  %1761 = vmatprep.subr.bf16.mxu0 %v2233_v34  ;;  %v2246_v12 = vsub.f32 %v90_v4, %v151_v59  ;;  %v2719_v37 = vand.u32 4294901760, %v2186_v9  ;;  %v2718_v10 = vand.u32 4294901760, %v2192_v2 }
  0x4f   :  { %2816 = vst [vmem:[#allocation23_spill] sm:$0xff] %v2237_v36  ;;  %v1782_v57 = vpack.c.bf16 %v393_v24, %v386_v13  ;;  %v512_v11 = vand.u32 4294901760, %v511_v5  ;;  %v519_v19 = vand.u32 4294901760, %v518_v43  ;;  %v2260_v13 = vand.u32 4294901760, %v61_v44 }
  0x50   :  { %2817 = vst [vmem:[#allocation24_spill] sm:$0xff] %v2246_v12  ;;  %v2250_v60 = vpack.c.bf16 %v154_v30, %v151_v59  ;;  %v2252_v56 = vsub.f32 %v91_v54, %v154_v30  ;;  %v399_v1 = vsub.f32 %v2186_v9, %v2719_v37  ;;  %v406_v4 = vsub.f32 %v2192_v2, %v2718_v10  ;;  %v62_v37 = vld [vmem:[#allocation2 + $0x10] sm:$0xff] }
  0x51   :  { %1783 = vmatpush3.bf16.msra.mxu1 %v1782_v57  ;;  %2820 = vst [vmem:[#allocation27_spill] sm:$0xff] %v2260_v13  ;;  %v2262_v24 = vand.u32 4294901760, %v60_v42  ;;  %v1784_v34 = vpack.c.bf16 %v519_v19, %v512_v11  ;;  %v2724_v59 = vand.u32 4294901760, %v2205_v58  ;;  %v2727_v54 = vand.u32 4294901760, %v2207_v35  ;;  %550 = vmatprep.mubr.f32.mxu1 %v2260_v13 }
  0x52   :  { %2818 = vst [vmem:[#allocation25_spill] sm:$0xff] %v2250_v60  ;;  %2819 = vst [vmem:[#allocation26_spill] sm:$0xff] %v2252_v56  ;;  %1763 = vmatpush3.bf16.msra.mxu0 %v2250_v60  ;;  %v1796_v30 = vpack.c.bf16 %v2077_v33, %v2075_v32  ;;  %v400_v5 = vand.u32 4294901760, %v399_v1  ;;  %v407_v43 = vand.u32 4294901760, %v406_v4  ;;  %v2270_v57 = vsub.f32 %v61_v44, %v2260_v13  ;;  %v63_v4 = vld [vmem:[#allocation2 + $0x18] sm:$0xff] }
  0x53   :  { %2821 = vst [vmem:[#allocation28_spill] sm:$0xff] %v2262_v24  ;;  %v2273_v10 = vsub.f32 %v60_v42, %v2262_v24  ;;  %1785 = vmatprep.subr.bf16.mxu1 %v1784_v34  ;;  %v525_v11 = vsub.f32 %v2205_v58, %v2724_v59  ;;  %v532_v19 = vsub.f32 %v2207_v35, %v2727_v54  ;;  %v2732_v1 = vand.u32 4294901760, %v2216_v3 }
  0x54   :  { %2822 = vst [vmem:[#allocation29_spill] sm:$0xff] %v2270_v57  ;;  %1797 = vmatprep.subr.bf16.mxu0 %v1796_v30  ;;  %v2737_v44 = vand.u32 4294901760, %v2222_v55  ;;  %v1786_v42 = vpack.c.bf16 %v407_v43, %v400_v5  ;;  %v2738_v60 = vand.u32 4294901760, %v2270_v57  ;;  %v1798_v13 = vpack.c.bf16 %v2059_v21, %v2055_v15 }
  0x55   :  { %2823 = vst [vmem:[#allocation30_spill] sm:$0xff] %v2273_v10  ;;  %v2741_v34 = vand.u32 4294901760, %v2273_v10  ;;  %v526_v59 = vand.u32 4294901760, %v525_v11  ;;  %v533_v31 = vand.u32 4294901760, %v532_v19  ;;  %v413_v30 = vsub.f32 %v2216_v3, %v2732_v1 }
  0x56   :  { %v420_v54 = vsub.f32 %v2222_v55, %v2737_v44  ;;  %1787 = vmatpush3.bf16.msra.mxu1 %v1786_v42  ;;  %v207_v5 = vsub.f32 %v2270_v57, %v2738_v60  ;;  %v2300_v8 = vand.u32 4294901760, %v63_v4  ;;  %v2302_v11 = vand.u32 4294901760, %v62_v37  ;;  %v65_v57 = vld [vmem:[#allocation2 + $0x28] sm:$0xff] }
  0x57   :  { %v213_v43 = vsub.f32 %v2273_v10, %v2741_v34  ;;  %v1788_v19 = vpack.c.bf16 %v533_v31, %v526_v59  ;;  %v414_v25 = vand.u32 4294901760, %v413_v30  ;;  %v2745_v48 = vand.u32 4294901760, %v2235_v38 }
  0x58   :  { %2824 = vst [vmem:[#allocation31_spill] sm:$0xff] %v2300_v8  ;;  %2825 = vst [vmem:[#allocation32_spill] sm:$0xff] %v2302_v11  ;;  %v421_v1 = vand.u32 4294901760, %v420_v54  ;;  %v208_v6 = vand.u32 4294901760, %v207_v5  ;;  %v2306_v42 = vsub.f32 %v63_v4, %v2300_v8  ;;  %v2309_v60 = vsub.f32 %v62_v37, %v2302_v11  ;;  %v64_v5 = vld [vmem:[#allocation2 + $0x20] sm:$0xff] }
  0x59   :  { %v214_v44 = vand.u32 4294901760, %v213_v43  ;;  %1789 = vmatprep.subr.bf16.mxu1 %v1788_v19  ;;  %v539_v10 = vsub.f32 %v2235_v38, %v2745_v48  ;;  %v2744_v31 = vand.u32 4294901760, %v2237_v36  ;;  %v1800_v59 = vpack.c.bf16 %v2066_v26, %v2063_v23 }
  0x5a   :  { %2826 = vst [vmem:[#allocation33_spill] sm:$0xff] %v2306_v42  ;;  %2827 = vst [vmem:[#allocation34_spill] sm:$0xff] %v2309_v60  ;;  %v1790_v34 = vpack.c.bf16 %v421_v1, %v414_v25  ;;  %209 = vmatprep.mubr.f32.mxu0 %v208_v6  ;;  %v2746_v54 = vand.u32 4294901760, %v2306_v42  ;;  %v2749_v4 = vand.u32 4294901760, %v2309_v60  ;;  %v2756_v37 = vand.u32 4294901760, %v2246_v12 }
  0x5b   :  { %v2760_v30 = vand.u32 4294901760, %v2252_v56  ;;  %215 = vmatmul.mubr.f32.vlgmr.msra.gmra.mrb[0].mxu0 %v214_v44  ;;  %v540_v25 = vand.u32 4294901760, %v539_v10  ;;  %v546_v1 = vsub.f32 %v2237_v36, %v2744_v31  ;;  %v1802_v43 = vpack.c.bf16 %v2072_v29, %v2070_v28 }
  0x5c   :  { %1791 = vmatpush3.bf16.msra.mxu1 %v1790_v34  ;;  %v2326_v6 = vand.u32 4294901760, %v65_v57  ;;  %1799 = vmatpush3.bf16.msra.mxu0 %v1798_v13  ;;  %v222_v19 = vsub.f32 %v2306_v42, %v2746_v54  ;;  %v228_v44 = vsub.f32 %v2309_v60, %v2749_v4  ;;  %v427_v10 = vsub.f32 %v2246_v12, %v2756_v37  ;;  %v67_v42 = vld [vmem:[#allocation2 + $0x38] sm:$0xff]  ;;  %v66_v4 = vld [vmem:[#allocation2 + $0x30] sm:$0xff]  ;;  %v69_v12 = vld [vmem:[#allocation2 + $0x48] sm:$0xff] }
  0x5d   :  { %v434_v34 = vsub.f32 %v2252_v56, %v2760_v30  ;;  %v547_v31 = vand.u32 4294901760, %v546_v1  ;;  %1801 = vmatprep.subr.bf16.mxu0 %v1800_v59  ;;  %v2343_v48 = vand.u32 4294901760, %v64_v5  ;;  %v1804_v54 = vpack.c.bf16 %v2086_v41, %v2084_v40 }
  0x5e   :  { %2828 = vst [vmem:[#allocation35_spill] sm:$0xff] %v2326_v6  ;;  %v2341_v13 = vsub.f32 %v65_v57, %v2326_v6  ;;  %v223_v60 = vand.u32 4294901760, %v222_v19  ;;  %v229_v50 = vand.u32 4294901760, %v228_v44  ;;  %v428_v16 = vand.u32 4294901760, %v427_v10  ;;  %v68_v57 = vld [vmem:[#allocation2 + $0x40] sm:$0xff] }
  0x5f   :  { %2830 = vst [vmem:[#allocation37_spill] sm:$0xff] %v2343_v48  ;;  %v435_v37 = vand.u32 4294901760, %v434_v34  ;;  %v1792_v29 = vpack.c.bf16 %v547_v31, %v540_v25  ;;  %v2349_v59 = vsub.f32 %v64_v5, %v2343_v48  ;;  %v1806_v56 = vpack.c.bf16 %v2094_v47, %v2092_v46 }
  0x60   :  { %2829 = vst [vmem:[#allocation36_spill] sm:$0xff] %v2341_v13  ;;  %v2764_v30 = vand.u32 4294901760, %v2341_v13  ;;  %224 = vmatprep.mubr.f32.mxu0 %v223_v60  ;;  %1803 = vmatpush3.bf16.msra.mxu0 %v1802_v43  ;;  %v2353_v41 = vand.u32 4294901760, %v67_v42  ;;  %v2355_v19 = vand.u32 4294901760, %v66_v4  ;;  %v2361_v25 = vand.u32 4294901760, %v69_v12  ;;  %v71_v60 = vld [vmem:[#allocation2 + $0x58] sm:$0xff] }
  0x61   :  { %2831 = vst [vmem:[#allocation38_spill] sm:$0xff] %v2349_v59  ;;  %v1794_v1 = vpack.c.bf16 %v435_v37, %v428_v16  ;;  %230 = vmatmul.mubr.f32.gmra.mrb[2].mxu0 %v229_v50  ;;  %1793 = vmatprep.subr.bf16.mxu1 %v1792_v29  ;;  %v2765_v5 = vand.u32 4294901760, %v2349_v59  ;;  %v1808_v29 = vpack.c.bf16 %v2116_v0, %v2112_v61  ;;  %v2371_v50 = vand.u32 4294901760, %v68_v57  ;;  %v70_v43 = vld [vmem:[#allocation2 + $0x50] sm:$0xff] }
  0x62   :  { %2832 = vst [vmem:[#allocation39_spill] sm:$0xff] %v2353_v41  ;;  %v237_v31 = vsub.f32 %v2341_v13, %v2764_v30  ;;  %1805 = vmatprep.subr.bf16.mxu0 %v1804_v54  ;;  %v2364_v16 = vsub.f32 %v67_v42, %v2353_v41  ;;  %v2367_v37 = vsub.f32 %v66_v4, %v2355_v19  ;;  %v73_v30 = vld [vmem:[#allocation2 + $0x68] sm:$0xff] }
  0x63   :  { %1795 = vmatpush3.bf16.msra.mxu1 %v1794_v1  ;;  %v243_v10 = vsub.f32 %v2349_v59, %v2765_v5  ;;  %v1810_v42 = vpack.c.bf16 %v2132_v18, %v2130_v17  ;;  %v2380_v54 = vsub.f32 %v69_v12, %v2361_v25  ;;  %v2385_v1 = vsub.f32 %v68_v57, %v2371_v50 }
  0x64   :  { %2833 = vst [vmem:[#allocation40_spill] sm:$0xff] %v2364_v16  ;;  %2834 = vst [vmem:[#allocation41_spill] sm:$0xff] %v2367_v37  ;;  %v238_v44 = vand.u32 4294901760, %v237_v31  ;;  %1829 = vmatprep.subr.bf16.mxu1 %v2053_v14  ;;  %1807 = vmatpush3.bf16.msra.mxu0 %v1806_v56  ;;  %v2773_v4 = vand.u32 4294901760, %v2364_v16  ;;  %v2778_v34 = vand.u32 4294901760, %v2367_v37  ;;  %v2387_v31 = vand.u32 4294901760, %v71_v60 }
  0x65   :  { %2835 = vst [vmem:[#allocation42_spill] sm:$0xff] %v2380_v54  ;;  %2836 = vst [vmem:[#allocation43_spill] sm:$0xff] %v2385_v1  ;;  %v244_v5 = vand.u32 4294901760, %v243_v10  ;;  %v1812_v12 = vpack.c.bf16 %v2147_v52, %v2145_v51  ;;  %v2393_v56 = vand.u32 4294901760, %v70_v43  ;;  %1809 = vmatprep.subr.bf16.mxu0 %v1808_v29 }
  0x66   :  { %239 = vmatprep.mubr.f32.mxu0 %v238_v44  ;;  %552 = vmatmul.mubr.f32.vlgmr.msra.gmra.mrb[0].mxu1 %v2262_v24  ;;  %v252_v57 = vsub.f32 %v2364_v16, %v2773_v4  ;;  %v258_v44 = vsub.f32 %v2367_v37, %v2778_v34  ;;  %v2405_v59 = vsub.f32 %v71_v60, %v2387_v31  ;;  %v72_v24 = vld [vmem:[#allocation2 + $0x60] sm:$0xff]  ;;  %v2415_v16 = vand.u32 4294901760, %v73_v30 }
  0x67   :  { %1831 = vmatpush3.bf16.msra.mxu1 %v2057_v20  ;;  %557 = vmatprep.mubr.f32.mxu1 %v2300_v8  ;;  %v2838_v20 = vand.u32 4294901760, %v2380_v54  ;;  %v1814_v4 = vpack.c.bf16 %v2162_v7, %v2156_v62  ;;  %v2413_v8 = vsub.f32 %v70_v43, %v2393_v56 }
  0x68   :  { %2837 = vst [vmem:[#allocation44_spill] sm:$0xff] %v2405_v59  ;;  %245 = vmatmul.mubr.f32.gmra.mrb[4].mxu0 %v244_v5  ;;  %v253_v34 = vand.u32 4294901760, %v252_v57  ;;  %v259_v10 = vand.u32 4294901760, %v258_v44  ;;  %1833 = vmatprep.subr.bf16.mxu1 %v2061_v22  ;;  %v2840_v5 = vand.u32 4294901760, %v2385_v1  ;;  %v2785_v29 = vand.u32 4294901760, %v2405_v59  ;;  %v74_v44 = vld [vmem:[#allocation2 + $0x70] sm:$0xff] }
  0x69   :  { %v267_v13 = vsub.f32 %v2380_v54, %v2838_v20  ;;  %2839 = vst [vmem:[#allocation45_spill] sm:$0xff] %v2413_v8  ;;  %1811 = vmatpush3.bf16.msra.mxu0 %v1810_v42  ;;  %v75_v20 = vld [vmem:[#allocation2 + $0x78] sm:$0xff]  ;;  %v2790_v43 = vand.u32 4294901760, %v2413_v8  ;;  %v2425_v37 = vsub.f32 %v73_v30, %v2415_v16  ;;  %v2427_v57 = vand.u32 4294901760, %v72_v24 }
  0x6a   :  { %v273_v60 = vsub.f32 %v2385_v1, %v2840_v5  ;;  %559 = vmatmul.mubr.f32.gmra.mrb[2].mxu1 %v2302_v11  ;;  %1813 = vmatprep.subr.bf16.mxu0 %v1812_v12  ;;  %v282_v5 = vsub.f32 %v2405_v59, %v2785_v29  ;;  %v1818_v12 = vpack.c.bf16 %v2192_v2, %v2186_v9  ;;  %v2445_v11 = vand.u32 4294901760, %v75_v20 }
  0x6b   :  { %v268_v54 = vand.u32 4294901760, %v267_v13  ;;  %2841 = vst [vmem:[#allocation46_spill] sm:$0xff] %v2425_v37  ;;  %254 = vmatprep.mubr.f32.mxu0 %v253_v34  ;;  %1835 = vmatpush3.bf16.msra.mxu1 %v2068_v27  ;;  %v1816_v13 = vpack.c.bf16 %v2177_v53, %v2175_v49  ;;  %v288_v30 = vsub.f32 %v2413_v8, %v2790_v43  ;;  %v2795_v34 = vand.u32 4294901760, %v2425_v37 }
  0x6c   :  { %v274_v42 = vand.u32 4294901760, %v273_v60  ;;  %260 = vmatmul.mubr.f32.gmra.mrb[6].mxu0 %v259_v10  ;;  %564 = vmatprep.mubr.f32.mxu1 %v2326_v6  ;;  %v2443_v60 = vsub.f32 %v72_v24, %v2427_v57  ;;  %v283_v29 = vand.u32 4294901760, %v282_v5  ;;  %v1820_v10 = vpack.c.bf16 %v2207_v35, %v2205_v58 }
  0x6d   :  { %269 = vmatprep.mubr.f32.mxu0 %v268_v54  ;;  %1837 = vmatprep.subr.bf16.mxu1 %v2082_v39  ;;  %v1822_v6 = vpack.c.bf16 %v2222_v55, %v2216_v3  ;;  %v2452_v59 = vand.u32 4294901760, %v74_v44  ;;  %v297_v24 = vsub.f32 %v2425_v37, %v2795_v34  ;;  %v2460_v43 = vsub.f32 %v75_v20, %v2445_v11 }
  0x6e   :  { %566 = vmatmul.mubr.f32.gmra.mrb[4].mxu1 %v2343_v48  ;;  %1815 = vmatpush3.bf16.msra.mxu0 %v1814_v4  ;;  %v1824_v5 = vpack.c.bf16 %v2237_v36, %v2235_v38  ;;  %v289_v8 = vand.u32 4294901760, %v288_v30  ;;  %v2842_v4 = vand.u32 4294901760, %v2075_v32  ;;  %v2843_v34 = vand.u32 4294901760, %v2077_v33 }
  0x6f   :  { %1839 = vmatpush3.bf16.msra.mxu1 %v2090_v45  ;;  %571 = vmatprep.mubr.f32.mxu1 %v2353_v41  ;;  %v2467_v48 = vsub.f32 %v74_v44, %v2452_v59  ;;  %v2844_v54 = vand.u32 4294901760, %v2055_v15  ;;  %v2845_v20 = vand.u32 4294901760, %v2059_v21  ;;  %v298_v36 = vand.u32 4294901760, %v297_v24 }
  0x70   :  { %v1860_v37 = vpack.c.bf16 %v2843_v34, %v2842_v4  ;;  %275 = vmatmul.mubr.f32.gmra.mrb[8].mxu0 %v274_v42  ;;  %1817 = vmatprep.subr.bf16.mxu0 %v1816_v13  ;;  %v2846_v38 = vand.u32 4294901760, %v2443_v60  ;;  %v311_v44 = vand.u32 4294901760, %v2460_v43  ;;  %v2847_v41 = vand.u32 4294901760, %v2063_v23  ;;  %v2850_v42 = vld [vmem:[#allocation12_spill] sm:$0xff] }
  0x71   :  { %v1862_v1 = vpack.c.bf16 %v2845_v20, %v2844_v54  ;;  %v2848_v32 = vand.u32 4294901760, %v2066_v26  ;;  %284 = vmatprep.mubr.f32.mxu0 %v283_v29  ;;  %1841 = vmatprep.subr.bf16.mxu1 %v2114_v63  ;;  %v317_v15 = vand.u32 4294901760, %v2467_v48  ;;  %v2849_v21 = vand.u32 4294901760, %v2070_v28 }
  0x72   :  { %v303_v30 = vsub.f32 %v2443_v60, %v2846_v38  ;;  %v2851_v13 = vand.u32 4294901760, %v2850_v42  ;;  %v2852_v24 = vand.u32 4294901760, %v2084_v40  ;;  %v2853_v38 = vld [vmem:[#allocation13_spill] sm:$0xff]  ;;  %v2855_v23 = vand.u32 4294901760, %v2092_v46  ;;  %573 = vmatmul.mubr.f32.gmra.mrb[6].mxu1 %v2355_v19  ;;  %1819 = vmatpush3.bf16.msra.mxu0 %v1818_v12  ;;  %v2861_v42 = vld [vmem:[#allocation14_spill] sm:$0xff] }
  0x73   :  { %v1864_v33 = vpack.c.bf16 %v2848_v32, %v2847_v41  ;;  %v2854_v54 = vand.u32 4294901760, %v2853_v38  ;;  %v2856_v26 = vand.u32 4294901760, %v2094_v47  ;;  %v312_v28 = vsub.f32 %v2460_v43, %v311_v44  ;;  %1843 = vmatpush3.bf16.msra.mxu1 %v2861_v42  ;;  %578 = vmatprep.mubr.f32.mxu1 %v2361_v25 }
  0x74   :  { %v1866_v34 = vpack.c.bf16 %v2851_v13, %v2849_v21  ;;  %v2857_v29 = vand.u32 4294901760, %v2112_v61  ;;  %v2858_v20 = vand.u32 4294901760, %v2116_v0  ;;  %v2859_v32 = vand.u32 4294901760, %v2130_v17  ;;  %290 = vmatmul.mubr.f32.gmra.mrb[10].mxu0 %v289_v8  ;;  %1821 = vmatprep.subr.bf16.mxu0 %v1820_v10  ;;  %v2872_v8 = vld [vmem:[#allocation15_spill] sm:$0xff] }
  0x75   :  { %v1868_v4 = vpack.c.bf16 %v2854_v54, %v2852_v24  ;;  %v1870_v41 = vpack.c.bf16 %v2856_v26, %v2855_v23  ;;  %v2860_v21 = vand.u32 4294901760, %v2132_v18  ;;  %v318_v47 = vsub.f32 %v2467_v48, %v317_v15  ;;  %299 = vmatprep.mubr.f32.mxu0 %v298_v36  ;;  %1845 = vmatprep.subr.bf16.mxu1 %v2872_v8 }
  0x76   :  { %v1872_v40 = vpack.c.bf16 %v2858_v20, %v2857_v29  ;;  %v2862_v12 = vand.u32 4294901760, %v2145_v51  ;;  %v2863_v61 = vand.u32 4294901760, %v2147_v52  ;;  %v2864_v0 = vand.u32 4294901760, %v2156_v62  ;;  %580 = vmatmul.mubr.f32.gmra.mrb[8].mxu1 %v2371_v50  ;;  %1823 = vmatpush3.bf16.msra.mxu0 %v1822_v6  ;;  %v2877_v20 = vld [vmem:[#allocation16_spill] sm:$0xff]  ;;  %v2881_v6 = vld [vmem:[#allocation29_spill] sm:$0xff] }
  0x77   :  { %v1874_v46 = vpack.c.bf16 %v2860_v21, %v2859_v32  ;;  %v2865_v17 = vand.u32 4294901760, %v2162_v7  ;;  %v304_v18 = vand.u32 4294901760, %v303_v30  ;;  %v2866_v38 = vand.u32 4294901760, %v2175_v49  ;;  %1847 = vmatpush3.bf16.msra.mxu1 %v2877_v20  ;;  %585 = vmatprep.mubr.f32.mxu1 %v2387_v31  ;;  %v2884_v32 = vld [vmem:[#allocation21_spill] sm:$0xff] }
  0x78   :  { %v1876_v13 = vpack.c.bf16 %v2863_v61, %v2862_v12  ;;  %v2867_v54 = vand.u32 4294901760, %v2177_v53  ;;  %v2868_v51 = vand.u32 4294901760, %v2186_v9  ;;  %v2869_v52 = vand.u32 4294901760, %v2192_v2  ;;  %v2875_v2 = vld [vmem:[#allocation24_spill] sm:$0xff]  ;;  %v2876_v9 = vld [vmem:[#allocation26_spill] sm:$0xff]  ;;  %1825 = vmatprep.subr.bf16.mxu0 %v1824_v5  ;;  %v2885_v21 = vld [vmem:[#allocation33_spill] sm:$0xff] }
  0x79   :  { %v2524_v24 = vpack.c.bf16 %v2865_v17, %v2864_v0  ;;  %v2870_v62 = vand.u32 4294901760, %v2205_v58  ;;  %v2871_v7 = vand.u32 4294901760, %v2207_v35  ;;  %v313_v49 = vand.u32 4294901760, %v312_v28  ;;  %305 = vmatmul.mubr.f32.gmra.mrb[12].mxu0 %v304_v18  ;;  %v2878_v35 = vld [vmem:[#allocation17_spill] sm:$0xff]  ;;  %v2882_v28 = vld [vmem:[#allocation20_spill] sm:$0xff]  ;;  %v2883_v5 = vld [vmem:[#allocation30_spill] sm:$0xff] }
  0x7a   :  { %v2530_v23 = vpack.c.bf16 %v2867_v54, %v2866_v38  ;;  %v2536_v26 = vpack.c.bf16 %v2869_v52, %v2868_v51  ;;  %v2873_v53 = vand.u32 4294901760, %v2216_v3  ;;  %v2874_v10 = vand.u32 4294901760, %v2222_v55  ;;  %1849 = vmatprep.subr.bf16.mxu1 %v2878_v35  ;;  %587 = vmatmul.mubr.f32.gmra.mrb[10].mxu1 %v2393_v56  ;;  %v2879_v55 = vld [vmem:[#allocation18_spill] sm:$0xff]  ;;  %v2880_v3 = vld [vmem:[#allocation19_spill] sm:$0xff]  ;;  %v2889_v61 = vld [vmem:[#allocation36_spill] sm:$0xff] }
  0x7b   :  { %v2542_v29 = vpack.c.bf16 %v2871_v7, %v2870_v62  ;;  %v1826_v58 = vpack.c.bf16 %v2876_v9, %v2875_v2  ;;  %v319_v36 = vand.u32 4294901760, %v318_v47  ;;  %314 = vmatprep.mubr.f32.mxu0 %v313_v49  ;;  %1851 = vmatpush3.bf16.msra.mxu1 %v2879_v55  ;;  %v2886_v47 = vld [vmem:[#allocation25_spill] sm:$0xff]  ;;  %v2888_v12 = vld [vmem:[#allocation34_spill] sm:$0xff]  ;;  %v2890_v0 = vand.u32 4294901760, %v2883_v5  ;;  %v2894_v18 = vld [vmem:[#allocation40_spill] sm:$0xff] }
  0x7c   :  { %v2549_v30 = vpack.c.bf16 %v2874_v10, %v2873_v53  ;;  %592 = vmatprep.mubr.f32.mxu1 %v2415_v16  ;;  %1853 = vmatprep.subr.bf16.mxu1 %v2880_v3  ;;  %v2893_v17 = vld [vmem:[#allocation38_spill] sm:$0xff]  ;;  %v2914_v62 = vand.u32 4294901760, %v2876_v9  ;;  %v2917_v49 = vld [vmem:[#allocation27_spill] sm:$0xff]  ;;  %v2918_v53 = vand.u32 4294901760, %v2443_v60  ;;  %v2919_v10 = vld [vmem:[#allocation28_spill] sm:$0xff] }
  0x7d   :  { %1827 = vmatpush3.bf16.msra.mxu0 %v1826_v58  ;;  %v2898_v38 = vld [vmem:[#allocation42_spill] sm:$0xff] }
  0x7e   :  { %320 = vmatmul.mubr.f32.gmra.mrb[14].mxu0 %v319_v36  ;;  %1861 = vmatprep.subr.bf16.mxu0 %v1860_v37  ;;  %v2887_v37 = vand.u32 4294901760, %v2881_v6 }
  0x7f   :  { %736 = vmatprep.mubr.f32.mxu0 %v2881_v6  ;;  %594 = vmatmul.mubr.f32.gmra.mrb[12].mxu1 %v2427_v57 }
  0x80   :  { %1855 = vmatpush3.bf16.msra.mxu1 %v2882_v28  ;;  %599 = vmatprep.mubr.f32.mxu1 %v2445_v11 }
  0x81   :  { %1857 = vmatprep.subr.bf16.mxu1 %v2884_v32 }
  0x82   :  { %739 = vmatmul.mubr.f32.vlgmr.msra.gmra.mrb[16].mxu0 %v2883_v5 }
  0x83   :  { %1863 = vmatpush3.bf16.msra.mxu0 %v1862_v1  ;;  %745 = vmatprep.mubr.f32.mxu0 %v2885_v21  ;;  %v2891_v1 = vld [vmem:[#allocation11_spill] sm:$0xff] }
  0x84   :  { %601 = vmatmul.mubr.f32.gmra.mrb[14].mxu1 %v2452_v59  ;;  %1865 = vmatprep.subr.bf16.mxu0 %v1864_v33  ;;  %v2892_v33 = vand.u32 4294901760, %v2885_v21 }
  0x85   :  { %1859 = vmatpush3.bf16.msra.mxu1 %v2886_v47  ;;  %906 = vmatprep.mubr.f32.mxu1 %v2887_v37 }
  0x86   :  { %748 = vmatmul.mubr.f32.gmra.mrb[18].mxu0 %v2888_v12  ;;  %1893 = vmatprep.subr.bf16.mxu1 %v2053_v14  ;;  %v2895_v14 = vand.u32 4294901760, %v2888_v12 }
  0x87   :  { %1867 = vmatpush3.bf16.msra.mxu0 %v1866_v34  ;;  %754 = vmatprep.mubr.f32.mxu0 %v2889_v61  ;;  %v2896_v34 = vand.u32 4294901760, %v2889_v61 }
  0x88   :  { %910 = vmatmul.mubr.f32.vlgmr.msra.gmra.mrb[16].mxu1 %v2890_v0  ;;  %1869 = vmatprep.subr.bf16.mxu0 %v1868_v4  ;;  %v2897_v4 = vld [vmem:[#allocation41_spill] sm:$0xff] }
  0x89   :  { %1895 = vmatpush3.bf16.msra.mxu1 %v2891_v1  ;;  %917 = vmatprep.mubr.f32.mxu1 %v2892_v33 }
  0x8a   :  { %757 = vmatmul.mubr.f32.gmra.mrb[20].mxu0 %v2893_v17  ;;  %1897 = vmatprep.subr.bf16.mxu1 %v2061_v22  ;;  %v2899_v22 = vand.u32 4294901760, %v2893_v17 }
  0x8b   :  { %1871 = vmatpush3.bf16.msra.mxu0 %v1870_v41  ;;  %763 = vmatprep.mubr.f32.mxu0 %v2894_v18  ;;  %v2900_v41 = vand.u32 4294901760, %v2894_v18 }
  0x8c   :  { %921 = vmatmul.mubr.f32.gmra.mrb[18].mxu1 %v2895_v14  ;;  %1873 = vmatprep.subr.bf16.mxu0 %v1872_v40  ;;  %v2902_v40 = vld [vmem:[#allocation44_spill] sm:$0xff] }
  0x8d   :  { %1899 = vmatpush3.bf16.msra.mxu1 %v2068_v27  ;;  %928 = vmatprep.mubr.f32.mxu1 %v2896_v34  ;;  %v2901_v27 = vld [vmem:[#allocation43_spill] sm:$0xff]  ;;  %v2912_v52 = vand.u32 4294901760, %v2902_v40 }
  0x8e   :  { %766 = vmatmul.mubr.f32.gmra.mrb[22].mxu0 %v2897_v4  ;;  %1901 = vmatprep.subr.bf16.mxu1 %v2082_v39  ;;  %v2903_v39 = vand.u32 4294901760, %v2897_v4 }
  0x8f   :  { %1875 = vmatpush3.bf16.msra.mxu0 %v1874_v46  ;;  %772 = vmatprep.mubr.f32.mxu0 %v2898_v38  ;;  %v2905_v46 = vld [vmem:[#allocation45_spill] sm:$0xff] }
  0x90   :  { %932 = vmatmul.mubr.f32.gmra.mrb[20].mxu1 %v2899_v22  ;;  %1877 = vmatprep.subr.bf16.mxu0 %v1876_v13  ;;  %v2907_v13 = vand.u32 4294901760, %v2901_v27 }
  0x91   :  { %1903 = vmatpush3.bf16.msra.mxu1 %v2090_v45  ;;  %939 = vmatprep.mubr.f32.mxu1 %v2900_v41  ;;  %v2904_v45 = vand.u32 4294901760, %v2898_v38 }
  0x92   :  { %775 = vmatmul.mubr.f32.gmra.mrb[24].mxu0 %v2901_v27  ;;  %1905 = vmatprep.subr.bf16.mxu1 %v2114_v63  ;;  %v2906_v63 = vld [vmem:[#allocation46_spill] sm:$0xff] }
  0x93   :  { %1879 = vmatpush3.bf16.msra.mxu0 %v2524_v24  ;;  %781 = vmatprep.mubr.f32.mxu0 %v2902_v40  ;;  %v2908_v24 = vld [vmem:[#allocation22_spill] sm:$0xff] }
  0x94   :  { %943 = vmatmul.mubr.f32.gmra.mrb[22].mxu1 %v2903_v39  ;;  %1881 = vmatprep.subr.bf16.mxu0 %v2530_v23  ;;  %v2909_v54 = vand.u32 4294901760, %v2908_v24  ;;  %v2910_v23 = vld [vmem:[#allocation23_spill] sm:$0xff] }
  0x95   :  { %1907 = vmatpush3.bf16.msra.mxu1 %v2861_v42  ;;  %950 = vmatprep.mubr.f32.mxu1 %v2904_v45  ;;  %v2911_v42 = vand.u32 4294901760, %v2910_v23 }
  0x96   :  { %784 = vmatmul.mubr.f32.gmra.mrb[26].mxu0 %v2905_v46  ;;  %1909 = vmatprep.subr.bf16.mxu1 %v2872_v8  ;;  %v2916_v8 = vand.u32 4294901760, %v2906_v63 }
  0x97   :  { %1883 = vmatpush3.bf16.msra.mxu0 %v2536_v26  ;;  %790 = vmatprep.mubr.f32.mxu0 %v2906_v63  ;;  %v1888_v51 = vpack.c.bf16 %v2911_v42, %v2909_v54  ;;  %v2913_v26 = vand.u32 4294901760, %v2875_v2  ;;  %v2922_v2 = vld [vmem:[#allocation35_spill] sm:$0xff] }
  0x98   :  { %954 = vmatmul.mubr.f32.gmra.mrb[24].mxu1 %v2907_v13  ;;  %1885 = vmatprep.subr.bf16.mxu0 %v2542_v29  ;;  %v2915_v29 = vand.u32 4294901760, %v2905_v46 }
  0x99   :  { %1911 = vmatpush3.bf16.msra.mxu1 %v2877_v20  ;;  %961 = vmatprep.mubr.f32.mxu1 %v2912_v52  ;;  %v1890_v7 = vpack.c.bf16 %v2914_v62, %v2913_v26 }
  0x9a   :  { %793 = vmatmul.mubr.f32.gmra.mrb[28].mxu0 %v2443_v60  ;;  %1913 = vmatprep.subr.bf16.mxu1 %v2878_v35  ;;  %v2921_v60 = vld [vmem:[#allocation32_spill] sm:$0xff] }
  0x9b   :  { %1887 = vmatpush3.bf16.msra.mxu0 %v2549_v30  ;;  %799 = vmatprep.mubr.f32.mxu0 %v2460_v43  ;;  %v2920_v30 = vld [vmem:[#allocation31_spill] sm:$0xff]  ;;  %v2923_v43 = vld [vmem:[#allocation37_spill] sm:$0xff] }
  0x9c   :  { %965 = vmatmul.mubr.f32.gmra.mrb[26].mxu1 %v2915_v29  ;;  %1889 = vmatprep.subr.bf16.mxu0 %v1888_v51 }
  0x9d   :  { %1915 = vmatpush3.bf16.msra.mxu1 %v2879_v55  ;;  %972 = vmatprep.mubr.f32.mxu1 %v2916_v8 }
  0x9e   :  { %802 = vmatmul.mubr.f32.gmra.mrb[30].mxu0 %v2467_v48  ;;  %1917 = vmatprep.subr.bf16.mxu1 %v2880_v3 }
  0x9f   :  { %1891 = vmatpush3.bf16.msra.mxu0 %v1890_v7  ;;  %1153 = vmatprep.mubr.f32.mxu0 %v2917_v49 }
  0xa0   :  { %976 = vmatmul.mubr.f32.gmra.mrb[28].mxu1 %v2918_v53 }
  0xa1   :  { %1919 = vmatpush3.bf16.msra.mxu1 %v2882_v28  ;;  %983 = vmatprep.mubr.f32.mxu1 %v311_v44  ;;  %v2924_v44 = vld [vmem:[#allocation39_spill] sm:$0xff] }
  0xa2   :  { %1155 = vmatmul.mubr.f32.vlgmr.msra.gmra.mrb[32].mxu0 %v2919_v10  ;;  %1921 = vmatprep.subr.bf16.mxu1 %v2884_v32 }
  0xa3   :  { %1160 = vmatprep.mubr.f32.mxu0 %v2920_v30 }
  0xa4   :  { %987 = vmatmul.mubr.f32.gmra.mrb[30].mxu1 %v317_v15 }
  0xa5   :  { %1923 = vmatpush3.bf16.msra.mxu1 %v2886_v47  ;;  %1306 = vmatprep.mubr.f32.mxu1 %v2917_v49 }
  0xa6   :  { %1162 = vmatmul.mubr.f32.gmra.mrb[34].mxu0 %v2921_v60 }
  0xa7   :  { %1167 = vmatprep.mubr.f32.mxu0 %v2922_v2 }
  0xa8   :  { %1308 = vmatmul.mubr.f32.vlgmr.msra.gmra.mrb[32].mxu1 %v2919_v10 }
  0xa9   :  { %1313 = vmatprep.mubr.f32.mxu1 %v2920_v30 }
  0xaa   :  { %1169 = vmatmul.mubr.f32.gmra.mrb[36].mxu0 %v2923_v43 }
  0xab   :  { %1174 = vmatprep.mubr.f32.mxu0 %v2924_v44 }
  0xac   :  { %1315 = vmatmul.mubr.f32.gmra.mrb[34].mxu1 %v2921_v60 }
  0xad   :  { %1320 = vmatprep.mubr.f32.mxu1 %v2922_v2 }
  0xae   :  { %1176 = vmatmul.mubr.f32.gmra.mrb[38].mxu0 %v2355_v19 }
  0xaf   :  { %1181 = vmatprep.mubr.f32.mxu0 %v2361_v25 }
  0xb0   :  { %1322 = vmatmul.mubr.f32.gmra.mrb[36].mxu1 %v2923_v43 }
  0xb1   :  { %1327 = vmatprep.mubr.f32.mxu1 %v2924_v44 }
  0xb2   :  { %1183 = vmatmul.mubr.f32.gmra.mrb[40].mxu0 %v2371_v50 }
  0xb3   :  { %1188 = vmatprep.mubr.f32.mxu0 %v2387_v31 }
  0xb4   :  { %1329 = vmatmul.mubr.f32.gmra.mrb[38].mxu1 %v2355_v19 }
  0xb5   :  { %1334 = vmatprep.mubr.f32.mxu1 %v2361_v25 }
  0xb6   :  { %1190 = vmatmul.mubr.f32.gmra.mrb[42].mxu0 %v2393_v56 }
  0xb7   :  { %1195 = vmatprep.mubr.f32.mxu0 %v2415_v16 }
  0xb8   :  { %1336 = vmatmul.mubr.f32.gmra.mrb[40].mxu1 %v2371_v50 }
  0xb9   :  { %1341 = vmatprep.mubr.f32.mxu1 %v2387_v31 }
  0xba   :  { %1197 = vmatmul.mubr.f32.gmra.mrb[44].mxu0 %v2427_v57 }
  0xbb   :  { %1202 = vmatprep.mubr.f32.mxu0 %v2445_v11 }
  0xbc   :  { %1343 = vmatmul.mubr.f32.gmra.mrb[42].mxu1 %v2393_v56 }
  0xbd   :  { %1348 = vmatprep.mubr.f32.mxu1 %v2415_v16 }
  0xbe   :  { %1204 = vmatmul.mubr.f32.gmra.mrb[46].mxu0 %v2452_v59 }
  0xc0   :  { %1350 = vmatmul.mubr.f32.gmra.mrb[44].mxu1 %v2427_v57 }
  0xc1   :  { %1355 = vmatprep.mubr.f32.mxu1 %v2445_v11 }
  0xc4   :  { %1357 = vmatmul.mubr.f32.gmra.mrb[46].mxu1 %v2452_v59 }
 0x12e   :  { %v1428_v48 = vpop.f32.mrb[0].mxu0 }
 0x12f   :  { %v1429_v19 = vpop.f32.mrb[1].mxu0 }
 0x130   :  { %v1430_v25 = vadd.f32 %v1429_v19, %v1428_v48 }
 0x134   :  { %v1431_v50 = vpop.f32.mrb[2].mxu0 }
 0x135   :  { %v1432_v31 = vpop.f32.mrb[3].mxu0 }
 0x136   :  { %v1433_v15 = vadd.f32 %v1432_v31, %v1431_v50 }
 0x139   :  { %v1484_v9 = vpop.f32.mrb[0].mxu1 }
 0x13a   :  { %v1485_v58 = vpop.f32.mrb[1].mxu1 }
 0x13b   :  { %v1486_v20 = vadd.f32 %v1485_v58, %v1484_v9  ;;  %v1434_v56 = vpop.f32.mrb[4].mxu0 }
 0x13c   :  { %v1435_v36 = vpop.f32.mrb[5].mxu0 }
 0x13d   :  { %v554_v16 = vadd.f32 %v1486_v20, %v1430_v25  ;;  %v1487_v35 = vpop.f32.mrb[2].mxu1  ;;  %v1436_v55 = vadd.f32 %v1435_v36, %v1434_v56 }
 0x13e   :  { %v1488_v3 = vpop.f32.mrb[3].mxu1 }
 0x13f   :  { %v1489_v57 = vadd.f32 %v1488_v3, %v1487_v35  ;;  %v1437_v6 = vpop.f32.mrb[6].mxu0 }
 0x140   :  { %v1438_v11 = vpop.f32.mrb[7].mxu0 }
 0x141   :  { %v561_v28 = vadd.f32 %v1489_v57, %v1433_v15  ;;  %v1490_v59 = vpop.f32.mrb[4].mxu1  ;;  %v1439_v5 = vadd.f32 %v1438_v11, %v1437_v6 }
 0x142   :  { %v1491_v32 = vpop.f32.mrb[5].mxu1 }
 0x143   :  { %v1492_v21 = vadd.f32 %v1491_v32, %v1490_v59  ;;  %v1440_v47 = vpop.f32.mrb[8].mxu0 }
 0x144   :  { %v1441_v37 = vpop.f32.mrb[9].mxu0 }
 0x145   :  { %v568_v12 = vadd.f32 %v1492_v21, %v1436_v55  ;;  %v1493_v61 = vpop.f32.mrb[6].mxu1  ;;  %v1442_v0 = vadd.f32 %v1441_v37, %v1440_v47 }
 0x146   :  { %v1494_v1 = vpop.f32.mrb[7].mxu1 }
 0x147   :  { %v1495_v33 = vadd.f32 %v1494_v1, %v1493_v61  ;;  %v1443_v17 = vpop.f32.mrb[10].mxu0 }
 0x148   :  { %v1444_v18 = vpop.f32.mrb[11].mxu0 }
 0x149   :  { %v575_v14 = vadd.f32 %v1495_v33, %v1439_v5  ;;  %v1496_v34 = vpop.f32.mrb[8].mxu1  ;;  %v1445_v4 = vadd.f32 %v1444_v18, %v1443_v17 }
 0x14a   :  { %v1497_v38 = vpop.f32.mrb[9].mxu1 }
 0x14b   :  { %v1498_v22 = vadd.f32 %v1497_v38, %v1496_v34 }
 0x14c   :  { %v1446_v41 = vpop.f32.mrb[12].mxu0 }
 0x14d   :  { %v1447_v27 = vpop.f32.mrb[13].mxu0  ;;  %v582_v40 = vadd.f32 %v1498_v22, %v1442_v0  ;;  %v1499_v39 = vpop.f32.mrb[10].mxu1 }
 0x14e   :  { %v1448_v45 = vadd.f32 %v1447_v27, %v1446_v41  ;;  %v1500_v46 = vpop.f32.mrb[11].mxu1 }
 0x14f   :  { %v1501_v63 = vadd.f32 %v1500_v46, %v1499_v39 }
 0x151   :  { %v1449_v13 = vpop.f32.mrb[14].mxu0  ;;  %v589_v54 = vadd.f32 %v1501_v63, %v1445_v4 }
 0x152   :  { %v1450_v24 = vpop.f32.mrb[15].mxu0  ;;  %v1502_v42 = vpop.f32.mrb[12].mxu1 }
 0x153   :  { %v1451_v23 = vadd.f32 %v1450_v24, %v1449_v13  ;;  %v1503_v51 = vpop.f32.mrb[13].mxu1 }
 0x154   :  { %v1504_v26 = vadd.f32 %v1503_v51, %v1502_v42 }
 0x155   :  { %v1540_v52 = vpop.f32.mrb[16].mxu0 }
 0x156   :  { %v1541_v62 = vpop.f32.mrb[17].mxu0  ;;  %v596_v7 = vadd.f32 %v1504_v26, %v1448_v45 }
 0x157   :  { %v1542_v29 = vadd.f32 %v1541_v62, %v1540_v52  ;;  %v1505_v8 = vpop.f32.mrb[14].mxu1 }
 0x158   :  { %v1506_v49 = vpop.f32.mrb[15].mxu1 }
 0x159   :  { %v741_v53 = vadd.f32 %v1542_v29, %v554_v16  ;;  %v1543_v10 = vpop.f32.mrb[18].mxu0  ;;  %v1507_v30 = vadd.f32 %v1506_v49, %v1505_v8 }
 0x15a   :  { %v1544_v60 = vpop.f32.mrb[19].mxu0 }
 0x15b   :  { %v603_v2 = vadd.f32 %v1507_v30, %v1451_v23  ;;  %v1545_v43 = vadd.f32 %v1544_v60, %v1543_v10  ;;  %v1596_v44 = vpop.f32.mrb[16].mxu1 }
 0x15c   :  { %v1597_v48 = vpop.f32.mrb[17].mxu1 }
 0x15d   :  { %v750_v19 = vadd.f32 %v1545_v43, %v561_v28  ;;  %v1546_v25 = vpop.f32.mrb[20].mxu0  ;;  %v1598_v50 = vadd.f32 %v1597_v48, %v1596_v44 }
 0x15e   :  { %v1547_v31 = vpop.f32.mrb[21].mxu0 }
 0x15f   :  { %v1548_v15 = vadd.f32 %v1547_v31, %v1546_v25  ;;  %v912_v9 = vadd.f32 %v1598_v50, %v741_v53  ;;  %v1599_v58 = vpop.f32.mrb[18].mxu1 }
 0x160   :  { %v1600_v20 = vpop.f32.mrb[19].mxu1 }
 0x161   :  { %v759_v56 = vadd.f32 %v1548_v15, %v568_v12  ;;  %v1549_v36 = vpop.f32.mrb[22].mxu0  ;;  %v1601_v35 = vadd.f32 %v1600_v20, %v1599_v58 }
 0x162   :  { %v1550_v55 = vpop.f32.mrb[23].mxu0 }
 0x163   :  { %v1551_v16 = vadd.f32 %v1550_v55, %v1549_v36  ;;  %v923_v3 = vadd.f32 %v1601_v35, %v750_v19  ;;  %v1602_v57 = vpop.f32.mrb[20].mxu1 }
 0x164   :  { %v1603_v6 = vpop.f32.mrb[21].mxu1 }
 0x165   :  { %v768_v11 = vadd.f32 %v1551_v16, %v575_v14  ;;  %v1552_v59 = vpop.f32.mrb[24].mxu0  ;;  %v1604_v5 = vadd.f32 %v1603_v6, %v1602_v57 }
 0x166   :  { %v1553_v32 = vpop.f32.mrb[25].mxu0 }
 0x167   :  { %v1554_v28 = vadd.f32 %v1553_v32, %v1552_v59  ;;  %v934_v21 = vadd.f32 %v1604_v5, %v759_v56  ;;  %v1605_v47 = vpop.f32.mrb[22].mxu1 }
 0x168   :  { %v1606_v37 = vpop.f32.mrb[23].mxu1 }
 0x169   :  { %v777_v61 = vadd.f32 %v1554_v28, %v582_v40  ;;  %v1555_v0 = vpop.f32.mrb[26].mxu0  ;;  %v1607_v1 = vadd.f32 %v1606_v37, %v1605_v47 }
 0x16a   :  { %v1556_v33 = vpop.f32.mrb[27].mxu0 }
 0x16b   :  { %v1557_v12 = vadd.f32 %v1556_v33, %v1555_v0  ;;  %v945_v17 = vadd.f32 %v1607_v1, %v768_v11  ;;  %v1608_v18 = vpop.f32.mrb[24].mxu1 }
 0x16c   :  { %v1609_v34 = vpop.f32.mrb[25].mxu1 }
 0x16d   :  { %v786_v4 = vadd.f32 %v1557_v12, %v589_v54  ;;  %v1558_v38 = vpop.f32.mrb[28].mxu0  ;;  %v1610_v22 = vadd.f32 %v1609_v34, %v1608_v18 }
 0x16e   :  { %v1559_v41 = vpop.f32.mrb[29].mxu0 }
 0x16f   :  { %v1560_v14 = vadd.f32 %v1559_v41, %v1558_v38  ;;  %v956_v27 = vadd.f32 %v1610_v22, %v777_v61  ;;  %v1611_v39 = vpop.f32.mrb[26].mxu1 }
 0x170   :  { %v1612_v45 = vpop.f32.mrb[27].mxu1 }
 0x171   :  { %v795_v46 = vadd.f32 %v1560_v14, %v596_v7  ;;  %v1561_v63 = vpop.f32.mrb[30].mxu0  ;;  %v1613_v13 = vadd.f32 %v1612_v45, %v1611_v39 }
 0x172   :  { %v1562_v24 = vpop.f32.mrb[31].mxu0 }
 0x173   :  { %v1563_v40 = vadd.f32 %v1562_v24, %v1561_v63  ;;  %v967_v23 = vadd.f32 %v1613_v13, %v786_v4  ;;  %v1614_v42 = vpop.f32.mrb[28].mxu1 }
 0x174   :  { %v1615_v51 = vpop.f32.mrb[29].mxu1 }
 0x175   :  { %v804_v52 = vadd.f32 %v1563_v40, %v603_v2  ;;  %v1652_v26 = vpop.f32.mrb[32].mxu0  ;;  %v1616_v62 = vadd.f32 %v1615_v51, %v1614_v42 }
 0x176   :  { %v1653_v29 = vpop.f32.mrb[33].mxu0 }
 0x177   :  { %v978_v54 = vadd.f32 %v1616_v62, %v795_v46  ;;  %v1654_v8 = vadd.f32 %v1653_v29, %v1652_v26  ;;  %v1617_v49 = vpop.f32.mrb[30].mxu1 }
 0x178   :  { %v1618_v53 = vpop.f32.mrb[31].mxu1 }
 0x179   :  { %v1157_v10 = vadd.f32 %v1654_v8, %v912_v9  ;;  %v1655_v30 = vpop.f32.mrb[34].mxu0  ;;  %v1619_v60 = vadd.f32 %v1618_v53, %v1617_v49 }
 0x17a   :  { %v1656_v43 = vpop.f32.mrb[35].mxu0 }
 0x17b   :  { %v989_v7 = vadd.f32 %v1619_v60, %v804_v52  ;;  %v1657_v44 = vadd.f32 %v1656_v43, %v1655_v30  ;;  %v1708_v48 = vpop.f32.mrb[32].mxu1 }
 0x17c   :  { %v1709_v19 = vpop.f32.mrb[33].mxu1 }
 0x17d   :  { %v1164_v25 = vadd.f32 %v1657_v44, %v923_v3  ;;  %v1658_v50 = vpop.f32.mrb[36].mxu0  ;;  %v1710_v31 = vadd.f32 %v1709_v19, %v1708_v48 }
 0x17e   :  { %v1659_v15 = vpop.f32.mrb[37].mxu0 }
 0x17f   :  { %v1660_v2 = vadd.f32 %v1659_v15, %v1658_v50  ;;  %v1310_v58 = vadd.f32 %v1710_v31, %v1157_v10  ;;  %v1711_v20 = vpop.f32.mrb[34].mxu1 }
 0x180   :  { %v1712_v56 = vpop.f32.mrb[35].mxu1 }
 0x181   :  { %v1171_v36 = vadd.f32 %v1660_v2, %v934_v21  ;;  %v1661_v35 = vpop.f32.mrb[38].mxu0  ;;  %v1713_v55 = vadd.f32 %v1712_v56, %v1711_v20  ;;  %1370 = vst [vmem:[#allocation7] sm:$0xff] %v1310_v58 }
 0x182   :  { %v1662_v16 = vpop.f32.mrb[39].mxu0 }
 0x183   :  { %v1663_v9 = vadd.f32 %v1662_v16, %v1661_v35  ;;  %v1317_v57 = vadd.f32 %v1713_v55, %v1164_v25  ;;  %v1714_v6 = vpop.f32.mrb[36].mxu1 }
 0x184   :  { %v1715_v11 = vpop.f32.mrb[37].mxu1 }
 0x185   :  { %v1178_v59 = vadd.f32 %v1663_v9, %v945_v17  ;;  %v1664_v5 = vpop.f32.mrb[40].mxu0  ;;  %v1716_v32 = vadd.f32 %v1715_v11, %v1714_v6  ;;  %1371 = vst [vmem:[#allocation7 + $0x8] sm:$0xff] %v1317_v57 }
 0x186   :  { %v1665_v3 = vpop.f32.mrb[41].mxu0 }
 0x187   :  { %v1666_v28 = vadd.f32 %v1665_v3, %v1664_v5  ;;  %v1324_v47 = vadd.f32 %v1716_v32, %v1171_v36  ;;  %v1717_v37 = vpop.f32.mrb[38].mxu1 }
 0x188   :  { %v1718_v61 = vpop.f32.mrb[39].mxu1 }
 0x189   :  { %v1185_v0 = vadd.f32 %v1666_v28, %v956_v27  ;;  %v1667_v1 = vpop.f32.mrb[42].mxu0  ;;  %v1719_v21 = vadd.f32 %v1718_v61, %v1717_v37  ;;  %1372 = vst [vmem:[#allocation7 + $0x10] sm:$0xff] %v1324_v47 }
 0x18a   :  { %v1668_v33 = vpop.f32.mrb[43].mxu0 }
 0x18b   :  { %v1669_v12 = vadd.f32 %v1668_v33, %v1667_v1  ;;  %v1331_v18 = vadd.f32 %v1719_v21, %v1178_v59  ;;  %v1720_v34 = vpop.f32.mrb[40].mxu1 }
 0x18c   :  { %v1721_v4 = vpop.f32.mrb[41].mxu1 }
 0x18d   :  { %v1192_v38 = vadd.f32 %v1669_v12, %v967_v23  ;;  %v1670_v22 = vpop.f32.mrb[44].mxu0  ;;  %v1722_v17 = vadd.f32 %v1721_v4, %v1720_v34  ;;  %1373 = vst [vmem:[#allocation7 + $0x18] sm:$0xff] %v1331_v18 }
 0x18e   :  { %v1671_v41 = vpop.f32.mrb[45].mxu0 }
 0x18f   :  { %v1672_v14 = vadd.f32 %v1671_v41, %v1670_v22  ;;  %v1338_v39 = vadd.f32 %v1722_v17, %v1185_v0  ;;  %v1723_v45 = vpop.f32.mrb[42].mxu1 }
 0x190   :  { %v1724_v46 = vpop.f32.mrb[43].mxu1 }
 0x191   :  { %v1199_v63 = vadd.f32 %v1672_v14, %v978_v54  ;;  %v1673_v13 = vpop.f32.mrb[46].mxu0  ;;  %v1725_v27 = vadd.f32 %v1724_v46, %v1723_v45  ;;  %1374 = vst [vmem:[#allocation7 + $0x20] sm:$0xff] %v1338_v39 }
 0x192   :  { %v1674_v24 = vpop.f32.mrb[47].mxu0 }
 0x193   :  { %v1675_v40 = vadd.f32 %v1674_v24, %v1673_v13  ;;  %v1345_v42 = vadd.f32 %v1725_v27, %v1192_v38  ;;  %v1726_v51 = vpop.f32.mrb[44].mxu1 }
 0x194   :  { %v1727_v52 = vpop.f32.mrb[45].mxu1 }
 0x195   :  { %v1206_v26 = vadd.f32 %v1675_v40, %v989_v7  ;;  %v1728_v62 = vadd.f32 %v1727_v52, %v1726_v51  ;;  %1375 = vst [vmem:[#allocation7 + $0x28] sm:$0xff] %v1345_v42 }
 0x197   :  { %v1352_v23 = vadd.f32 %v1728_v62, %v1199_v63  ;;  %v1729_v29 = vpop.f32.mrb[46].mxu1 }
 0x198   :  { %v1730_v8 = vpop.f32.mrb[47].mxu1 }
 0x199   :  { %v1731_v49 = vadd.f32 %v1730_v8, %v1729_v29  ;;  %1376 = vst [vmem:[#allocation7 + $0x30] sm:$0xff] %v1352_v23 }
 0x19b   :  { %v1359_v53 = vadd.f32 %v1731_v49, %v1206_v26 }
 0x19d   :  { %1377 = vst [vmem:[#allocation7 + $0x38] sm:$0xff] %v1359_v53 }
 0x19e   :  { %1987 = shalt.err (!%p1984_p6)
}
 0x19f   :  { %s1988_s12 = scalar_lea.hbm %s2693_s2, 1024 }
 0x1a0   :  { %p1989_p7 = scmp.ne.s32.totalorder %s2693_s2, %s1988_s12  ;;  %p1992_p8 = scmp.lt.u32.totalorder %s1988_s12, %s2693_s2 }
 0x1a2   :  { %p1994_p9 = pnand %p1992_p8, %p1989_p7 }
 0x1a4   :  { %1997 = shalt.err (!%p1994_p9)
}
 0x1a5   :  { %1389 = dma.vmem_to_hbm [thread:$0]  %s1384_s8, 1024, %s2693_s2, [#allocation4], %s2008_s0, %s2008_s0, %s2009_s5  }
 0x1a6   :  { %2002 = dma.done.wait [#allocation4], 1024  }
 0x1a7   :  { %2003 = vsyncadd [#allocation4], 4294966272 }
 0x1a8   :  { %1393 = vsyncpa [#allocation3], 1 }
 0x1a9   :  { %1394 = vsyncpa [#allocation6], 1 }
 0x1aa   :  { %1395 = vsyncpa [#allocation4], 1 }

</bundles_post_ra>
